<compile_context>
chip_gen: v6e
topology: v6e:2x2x1
jax: 0.10.0
libtpu: 0.0.40
codegen_flags: <defaults>
</compile_context>

<pallas_src>
import math
import jax
import jax.numpy as jnp
from jax import lax
from jax.experimental import pallas as pl

# ----------------- small config (consistent with the module) -----------------
D        = 32     # embed dim (d)
DK       = 8      # per-head dim
HEADS    = 4      # head_num
ENC_NUM  = 2      # encoder_num (shared weights applied ENC_NUM times)
IMG      = 16     # img_size
PATCH    = 4      # patch_size
CHANS    = 3      # in_chans
CLASSES  = 10     # class_num
LN_EPS   = 1e-5
LANE     = 128    # lane-dense padded logits width


# ------------------------------ in-kernel math ------------------------------
def _erf(x):
    # Abramowitz & Stegun 7.1.26 rational approximation (|err| ~ 1.5e-7).
    # TODO(synk): Mosaic erf lowering availability varies; polynomial keeps it safe.
    a1, a2, a3, a4, a5 = 0.254829592, -0.284496736, 1.421413741, -1.453152027, 1.061405429
    p = 0.3275911
    ax = jnp.abs(x)
    t = 1.0 / (1.0 + p * ax)
    poly = ((((a5 * t + a4) * t + a3) * t + a2) * t + a1) * t
    y = 1.0 - poly * jnp.exp(-ax * ax)
    return jnp.where(x >= 0, y, -y)


def _gelu_exact(x):
    return 0.5 * x * (1.0 + _erf(x * jnp.float32(1.0 / math.sqrt(2.0))))


def _layer_norm(h, w, b):
    mu = jnp.mean(h, axis=-1, keepdims=True)
    var = jnp.mean((h - mu) ** 2, axis=-1, keepdims=True)
    return (h - mu) * lax.rsqrt(var + jnp.float32(LN_EPS)) * w + b


# ------------------------- single fused Mix_ViT kernel -----------------------
def _mix_vit_kernel(patches_ref, rope_ref, mask_ref,
                    w32_ref, w128_ref, vec32_ref, vec128_ref,
                    out_ref):
    f32 = jnp.float32
    BS = rope_ref.shape[0]            # B * S  (flattened tokens)
    B = out_ref.shape[0]
    S = BS // B
    npatch = S - 1                    # patch tokens per image
    Np = B * npatch                   # pooled tokens total
    kf = patches_ref.shape[1]         # C * patch * patch

    # ---- unpack weight slabs (static, sublane-aligned slices) ----
    w_conv = w32_ref[0:kf, :]                         # (K, D)
    w_q    = w32_ref[kf:kf + D, :]                    # (D, D)
    w_k    = w32_ref[kf + D:kf + 2 * D, :]
    w_v    = w32_ref[kf + 2 * D:kf + 3 * D, :]
    w_o    = w32_ref[kf + 3 * D:kf + 4 * D, :]
    w_f2   = w32_ref[kf + 4 * D:kf + 8 * D, :]        # (4D, D)
    w_f1   = w128_ref[0:D, :]                         # (D, 4D)
    w_c    = w128_ref[D:2 * D, :]                     # (D, LANE)  zero-padded cols

    cls_row = vec32_ref[0:1, :]
    conv_b  = vec32_ref[1:2, :]
    ln1_w, ln1_b = vec32_ref[2:3, :], vec32_ref[3:4, :]
    b_q, b_k = vec32_ref[4:5, :], vec32_ref[5:6, :]
    b_v, b_o = vec32_ref[6:7, :], vec32_ref[7:8, :]
    ln2_w, ln2_b = vec32_ref[8:9, :], vec32_ref[9:10, :]
    b_f2 = vec32_ref[10:11, :]
    ln3_w, ln3_b = vec32_ref[11:12, :], vec32_ref[12:13, :]
    b_f1 = vec128_ref[0:1, :]
    b_c  = vec128_ref[1:2, :]

    # ---- patch embedding: conv-as-matmul (one MXU push) + 2x2 maxpool + bias ----
    pe = jnp.dot(patches_ref[...], w_conv, preferred_element_type=f32)   # (4*Np, D)
    tok = jnp.maximum(jnp.maximum(pe[0:Np], pe[Np:2 * Np]),
                      jnp.maximum(pe[2 * Np:3 * Np], pe[3 * Np:4 * Np])) + conv_b   # (Np, D)

    # ---- token assembly per image: [cls, patch tokens]; scale + positional enc ----
    pieces = []
    for b in range(B):
        pieces.append(cls_row)
        pieces.append(tok[b * npatch:(b + 1) * npatch, :])
    h = jnp.concatenate(pieces, axis=0) * f32(math.sqrt(D)) + rope_ref[...]   # (BS, D)

    neg_mask = mask_ref[...]          # (BS, BS) block-diagonal additive mask
    attn_scale = f32(1.0 / math.sqrt(DK))

    for _ in range(ENC_NUM):          # shared encoder weights applied ENC_NUM times
        # ---- self-attention sub-block (Pre-LN) ----
        n = _layer_norm(h, ln1_w, ln1_b)
        q = jnp.dot(n, w_q, preferred_element_type=f32) + b_q
        k = jnp.dot(n, w_k, preferred_element_type=f32) + b_k
        v = jnp.dot(n, w_v, preferred_element_type=f32) + b_v

        attn = jnp.zeros((BS, D), f32) + b_o     # heads folded into out-proj accumulator
        for hd in range(HEADS):
            sl = slice(hd * DK, (hd + 1) * DK)
            s = lax.dot_general(q[:, sl], k[:, sl], (((1,), (1,)), ((), ())),
                                preferred_element_type=f32) * attn_scale + neg_mask
            s = s - jnp.max(s, axis=-1, keepdims=True)
            p = jnp.exp(s)
            p = p * pl.reciprocal(jnp.sum(p, axis=-1, keepdims=True), approx=True)
            head = jnp.dot(p, v[:, sl], preferred_element_type=f32)          # (BS, DK)
            attn = attn + jnp.dot(head, w_o[sl, :], preferred_element_type=f32)
        h = h + attn

        # ---- feed-forward sub-block (Pre-LN) ----
        n2 = _layer_norm(h, ln2_w, ln2_b)
        f = jnp.dot(n2, w_f1, preferred_element_type=f32) + b_f1
        f = _gelu_exact(f)
        f = jnp.dot(f, w_f2, preferred_element_type=f32) + b_f2
        h = h + f

    # ---- classification head on the cls tokens (rows b*S), lane-dense output ----
    cls_tok = jnp.concatenate([h[b * S:b * S + 1, :] for b in range(B)], axis=0)   # (B, D)
    cls_tok = _layer_norm(cls_tok, ln3_w, ln3_b)
    out_ref[...] = jnp.dot(cls_tok, w_c, preferred_element_type=f32) + b_c          # (B, LANE)


# ----------------------------- params & wrapper ------------------------------
def init_params(key):
    ks = jax.random.split(key, 20)

    def nrm(k, shape, scale=0.02):
        return scale * jax.random.normal(k, shape, dtype=jnp.float32)

    p = {}
    p['conv_w'] = nrm(ks[0], (D, CHANS, PATCH, PATCH))      # torch Conv2d layout (out,in,kh,kw)
    p['conv_b'] = nrm(ks[1], (D,))
    p['cls_token'] = jax.random.normal(ks[2], (1, 1, D), dtype=jnp.float32)
    # shared encoder weights (stored as (in, out) for matmul)
    p['ln1_w'] = jnp.ones((D,), jnp.float32);  p['ln1_b'] = jnp.zeros((D,), jnp.float32)
    p['q_w'] = nrm(ks[3], (D, HEADS * DK));    p['q_b'] = nrm(ks[4], (HEADS * DK,))
    p['k_w'] = nrm(ks[5], (D, HEADS * DK));    p['k_b'] = nrm(ks[6], (HEADS * DK,))
    p['v_w'] = nrm(ks[7], (D, HEADS * DK));    p['v_b'] = nrm(ks[8], (HEADS * DK,))
    p['o_w'] = nrm(ks[9], (HEADS * DK, D));    p['o_b'] = nrm(ks[10], (D,))
    p['ln2_w'] = jnp.ones((D,), jnp.float32);  p['ln2_b'] = jnp.zeros((D,), jnp.float32)
    p['f1_w'] = nrm(ks[11], (D, 4 * D));       p['f1_b'] = nrm(ks[12], (4 * D,))
    p['f2_w'] = nrm(ks[13], (4 * D, D));       p['f2_b'] = nrm(ks[14], (D,))
    # classifier head
    p['ln3_w'] = jnp.ones((D,), jnp.float32);  p['ln3_b'] = jnp.zeros((D,), jnp.float32)
    p['c_w'] = nrm(ks[15], (D, CLASSES));      p['c_b'] = nrm(ks[16], (CLASSES,))
    return p


def rope_encode(seq_len, d):
    pos = jnp.arange(seq_len, dtype=jnp.float32)
    inv_freq = 1.0 / (10000.0 ** (jnp.arange(0, d, 2, dtype=jnp.float32) / d))
    sin_inp = pos[:, None] * inv_freq[None, :]
    return jnp.concatenate([jnp.sin(sin_inp), jnp.cos(sin_inp)], axis=-1)


def mix_vit_forward(x, params):
    B, C, H, W = x.shape
    gh, gw = H // PATCH, W // PATCH
    oh, ow = gh // 2, gw // 2
    npatch = oh * ow
    S = 1 + npatch
    BS = B * S
    Np = B * npatch
    K = C * PATCH * PATCH

    # conv patches grouped by their 2x2 max-pool window; pool-group-major rows.
    xp = x.astype(jnp.float32).reshape(B, C, oh, 2, PATCH, ow, 2, PATCH)
    xp = xp.transpose(3, 6, 0, 2, 5, 1, 4, 7)              # (di, dj, B, oh, ow, C, p, p)
    patches = xp.reshape(4 * Np, K)                        # (4*Np, K)

    conv_w = params['conv_w'].reshape(D, K).T              # (K, D), matches (c, kh, kw) flatten

    # ---- pack weights into 4 slabs ----
    w32 = jnp.concatenate([conv_w, params['q_w'], params['k_w'], params['v_w'],
                           params['o_w'], params['f2_w']], axis=0)            # (K+8D, D)

    c_w_pad = jnp.zeros((D, LANE), jnp.float32).at[:, :CLASSES].set(params['c_w'])
    w128 = jnp.concatenate([params['f1_w'], c_w_pad], axis=0)                 # (2D, LANE)

    def r(v):
        return v.reshape(1, -1)

    vec32 = jnp.concatenate(
        [r(params['cls_token']), r(params['conv_b']),
         r(params['ln1_w']), r(params['ln1_b']),
         r(params['q_b']), r(params['k_b']), r(params['v_b']), r(params['o_b']),
         r(params['ln2_w']), r(params['ln2_b']),
         r(params['f2_b']),
         r(params['ln3_w']), r(params['ln3_b'])], axis=0)                     # (13, D)

    c_b_pad = jnp.zeros((1, LANE), jnp.float32).at[:, :CLASSES].set(params['c_b'])
    vec128 = jnp.concatenate([r(params['f1_b']), c_b_pad], axis=0)            # (2, LANE)

    rope = jnp.tile(rope_encode(S, D), (B, 1))                                # (BS, D)

    # block-diagonal additive attention mask: tokens attend only within their image
    ids = jnp.repeat(jnp.arange(B, dtype=jnp.int32), S)
    neg_mask = jnp.where(ids[:, None] == ids[None, :], 0.0, -1e30).astype(jnp.float32)

    logits_pad = pl.pallas_call(
        _mix_vit_kernel,
        out_shape=jax.ShapeDtypeStruct((B, LANE), jnp.float32),
    )(patches, rope, neg_mask, w32, w128, vec32, vec128)

    return logits_pad[:, :CLASSES]


# ----------------------------------- main ------------------------------------
if __name__ == "__main__":
    key = jax.random.PRNGKey(0)
    pkey, xkey = jax.random.split(key)
    params = init_params(pkey)
    x = jax.random.normal(xkey, (2, CHANS, IMG, IMG), dtype=jnp.float32)  # [B, C, H, W]

    logits = jax.jit(mix_vit_forward)(x, params)
    jax.block_until_ready(logits)
    assert logits.shape == (2, CLASSES)
    print("KERNEL_OK")
</pallas_src>

<mosaic_0001>
module attributes {stable_mosaic.version = 11 : i64} {
  func.func @_mix_vit_kernel(%arg0: memref<32x48xf32, #tpu.memory_space<vmem>>, %arg1: memref<10x32xf32, #tpu.memory_space<vmem>>, %arg2: memref<10x10xf32, #tpu.memory_space<vmem>>, %arg3: memref<304x32xf32, #tpu.memory_space<vmem>>, %arg4: memref<64x128xf32, #tpu.memory_space<vmem>>, %arg5: memref<13x32xf32, #tpu.memory_space<vmem>>, %arg6: memref<2x128xf32, #tpu.memory_space<vmem>>, %arg7: memref<2x128xf32, #tpu.memory_space<vmem>>) attributes {dimension_semantics = [], scalar_prefetch = 0 : i64, scratch_operands = 0 : i64, tpu.core_type = #tpu.core_type<tc>} {
    %c0 = arith.constant 0 : index
    %c0_0 = arith.constant 0 : index
    %0 = vector.load %arg3[%c0, %c0_0] : memref<304x32xf32, #tpu.memory_space<vmem>>, vector<48x32xf32>
    %c48 = arith.constant 48 : index
    %c0_1 = arith.constant 0 : index
    %1 = vector.load %arg3[%c48, %c0_1] : memref<304x32xf32, #tpu.memory_space<vmem>>, vector<32x32xf32>
    %c80 = arith.constant 80 : index
    %c0_2 = arith.constant 0 : index
    %2 = vector.load %arg3[%c80, %c0_2] : memref<304x32xf32, #tpu.memory_space<vmem>>, vector<32x32xf32>
    %c112 = arith.constant 112 : index
    %c0_3 = arith.constant 0 : index
    %3 = vector.load %arg3[%c112, %c0_3] : memref<304x32xf32, #tpu.memory_space<vmem>>, vector<32x32xf32>
    %c144 = arith.constant 144 : index
    %c0_4 = arith.constant 0 : index
    %4 = vector.load %arg3[%c144, %c0_4] : memref<304x32xf32, #tpu.memory_space<vmem>>, vector<32x32xf32>
    %c176 = arith.constant 176 : index
    %c0_5 = arith.constant 0 : index
    %5 = vector.load %arg3[%c176, %c0_5] : memref<304x32xf32, #tpu.memory_space<vmem>>, vector<128x32xf32>
    %c0_6 = arith.constant 0 : index
    %c0_7 = arith.constant 0 : index
    %6 = vector.load %arg4[%c0_6, %c0_7] : memref<64x128xf32, #tpu.memory_space<vmem>>, vector<32x128xf32>
    %c32 = arith.constant 32 : index
    %c0_8 = arith.constant 0 : index
    %7 = vector.load %arg4[%c32, %c0_8] : memref<64x128xf32, #tpu.memory_space<vmem>>, vector<32x128xf32>
    %c0_9 = arith.constant 0 : index
    %c0_10 = arith.constant 0 : index
    %8 = vector.load %arg5[%c0_9, %c0_10] : memref<13x32xf32, #tpu.memory_space<vmem>>, vector<1x32xf32>
    %c1 = arith.constant 1 : index
    %c0_11 = arith.constant 0 : index
    %9 = vector.load %arg5[%c1, %c0_11] : memref<13x32xf32, #tpu.memory_space<vmem>>, vector<1x32xf32>
    %c2 = arith.constant 2 : index
    %c0_12 = arith.constant 0 : index
    %10 = vector.load %arg5[%c2, %c0_12] : memref<13x32xf32, #tpu.memory_space<vmem>>, vector<1x32xf32>
    %c3 = arith.constant 3 : index
    %c0_13 = arith.constant 0 : index
    %11 = vector.load %arg5[%c3, %c0_13] : memref<13x32xf32, #tpu.memory_space<vmem>>, vector<1x32xf32>
    %c4 = arith.constant 4 : index
    %c0_14 = arith.constant 0 : index
    %12 = vector.load %arg5[%c4, %c0_14] : memref<13x32xf32, #tpu.memory_space<vmem>>, vector<1x32xf32>
    %c5 = arith.constant 5 : index
    %c0_15 = arith.constant 0 : index
    %13 = vector.load %arg5[%c5, %c0_15] : memref<13x32xf32, #tpu.memory_space<vmem>>, vector<1x32xf32>
    %c6 = arith.constant 6 : index
    %c0_16 = arith.constant 0 : index
    %14 = vector.load %arg5[%c6, %c0_16] : memref<13x32xf32, #tpu.memory_space<vmem>>, vector<1x32xf32>
    %c7 = arith.constant 7 : index
    %c0_17 = arith.constant 0 : index
    %15 = vector.load %arg5[%c7, %c0_17] : memref<13x32xf32, #tpu.memory_space<vmem>>, vector<1x32xf32>
    %c8 = arith.constant 8 : index
    %c0_18 = arith.constant 0 : index
    %16 = vector.load %arg5[%c8, %c0_18] : memref<13x32xf32, #tpu.memory_space<vmem>>, vector<1x32xf32>
    %c9 = arith.constant 9 : index
    %c0_19 = arith.constant 0 : index
    %17 = vector.load %arg5[%c9, %c0_19] : memref<13x32xf32, #tpu.memory_space<vmem>>, vector<1x32xf32>
    %c10 = arith.constant 10 : index
    %c0_20 = arith.constant 0 : index
    %18 = vector.load %arg5[%c10, %c0_20] : memref<13x32xf32, #tpu.memory_space<vmem>>, vector<1x32xf32>
    %c11 = arith.constant 11 : index
    %c0_21 = arith.constant 0 : index
    %19 = vector.load %arg5[%c11, %c0_21] : memref<13x32xf32, #tpu.memory_space<vmem>>, vector<1x32xf32>
    %c12 = arith.constant 12 : index
    %c0_22 = arith.constant 0 : index
    %20 = vector.load %arg5[%c12, %c0_22] : memref<13x32xf32, #tpu.memory_space<vmem>>, vector<1x32xf32>
    %c0_23 = arith.constant 0 : index
    %c0_24 = arith.constant 0 : index
    %21 = vector.load %arg6[%c0_23, %c0_24] : memref<2x128xf32, #tpu.memory_space<vmem>>, vector<1x128xf32>
    %c1_25 = arith.constant 1 : index
    %c0_26 = arith.constant 0 : index
    %22 = vector.load %arg6[%c1_25, %c0_26] : memref<2x128xf32, #tpu.memory_space<vmem>>, vector<1x128xf32>
    %c0_27 = arith.constant 0 : index
    %c0_28 = arith.constant 0 : index
    %23 = vector.load %arg0[%c0_27, %c0_28] : memref<32x48xf32, #tpu.memory_space<vmem>>, vector<32x48xf32>
    %cst = arith.constant dense<0.000000e+00> : vector<32x32xf32>
    %24 = tpu.matmul %23, %0, %cst {dimension_numbers = #tpu.dot_dimension_numbers<[1], [0], [0], [1], [0, 0, 1, 1], [], []>} : vector<32x48xf32>, vector<48x32xf32>, vector<32x32xf32> -> vector<32x32xf32>
    %25 = vector.extract_strided_slice %24 {offsets = [0, 0], sizes = [8, 32], strides = [1, 1]} : vector<32x32xf32> to vector<8x32xf32>
    %26 = vector.extract_strided_slice %24 {offsets = [8, 0], sizes = [8, 32], strides = [1, 1]} : vector<32x32xf32> to vector<8x32xf32>
    %27 = arith.maximumf %25, %26 : vector<8x32xf32>
    %28 = vector.extract_strided_slice %24 {offsets = [16, 0], sizes = [8, 32], strides = [1, 1]} : vector<32x32xf32> to vector<8x32xf32>
    %29 = vector.extract_strided_slice %24 {offsets = [24, 0], sizes = [8, 32], strides = [1, 1]} : vector<32x32xf32> to vector<8x32xf32>
    %30 = arith.maximumf %28, %29 : vector<8x32xf32>
    %31 = arith.maximumf %27, %30 : vector<8x32xf32>
    %32 = vector.broadcast %9 : vector<1x32xf32> to vector<8x32xf32>
    %33 = arith.addf %31, %32 : vector<8x32xf32>
    %34 = vector.extract_strided_slice %33 {offsets = [0, 0], sizes = [4, 32], strides = [1, 1]} : vector<8x32xf32> to vector<4x32xf32>
    %35 = vector.extract_strided_slice %33 {offsets = [4, 0], sizes = [4, 32], strides = [1, 1]} : vector<8x32xf32> to vector<4x32xf32>
    %36 = tpu.concatenate %8, %34, %8, %35 in 0 : vector<1x32xf32>, vector<4x32xf32>, vector<1x32xf32>, vector<4x32xf32> -> vector<10x32xf32>
    %cst_29 = arith.constant 5.65685415 : f32
    %37 = vector.broadcast %cst_29 : f32 to vector<10x32xf32>
    %38 = arith.mulf %36, %37 : vector<10x32xf32>
    %c0_30 = arith.constant 0 : index
    %c0_31 = arith.constant 0 : index
    %39 = vector.load %arg1[%c0_30, %c0_31] : memref<10x32xf32, #tpu.memory_space<vmem>>, vector<10x32xf32>
    %40 = arith.addf %38, %39 : vector<10x32xf32>
    %c0_32 = arith.constant 0 : index
    %c0_33 = arith.constant 0 : index
    %41 = vector.load %arg2[%c0_32, %c0_33] : memref<10x10xf32, #tpu.memory_space<vmem>>, vector<10x10xf32>
    %cst_34 = arith.constant dense<0.000000e+00> : vector<10xf32>
    %42 = vector.multi_reduction <add>, %40, %cst_34 [1] : vector<10x32xf32> to vector<10xf32>
    %43 = vector.shape_cast %42 : vector<10xf32> to vector<10x1xf32>
    %cst_35 = arith.constant 3.200000e+01 : f32
    %44 = vector.broadcast %cst_35 : f32 to vector<10x1xf32>
    %45 = arith.divf %43, %44 : vector<10x1xf32>
    %46 = vector.broadcast %45 : vector<10x1xf32> to vector<10x32xf32>
    %47 = arith.subf %40, %46 : vector<10x32xf32>
    %48 = arith.mulf %47, %47 : vector<10x32xf32>
    %cst_36 = arith.constant dense<0.000000e+00> : vector<10xf32>
    %49 = vector.multi_reduction <add>, %48, %cst_36 [1] : vector<10x32xf32> to vector<10xf32>
    %50 = vector.shape_cast %49 : vector<10xf32> to vector<10x1xf32>
    %cst_37 = arith.constant 3.200000e+01 : f32
    %51 = vector.broadcast %cst_37 : f32 to vector<10x1xf32>
    %52 = arith.divf %50, %51 : vector<10x1xf32>
    %53 = vector.broadcast %45 : vector<10x1xf32> to vector<10x32xf32>
    %54 = arith.subf %40, %53 : vector<10x32xf32>
    %cst_38 = arith.constant 9.99999974E-6 : f32
    %55 = vector.broadcast %cst_38 : f32 to vector<10x1xf32>
    %56 = arith.addf %52, %55 : vector<10x1xf32>
    %57 = math.rsqrt %56 : vector<10x1xf32>
    %58 = vector.broadcast %57 : vector<10x1xf32> to vector<10x32xf32>
    %59 = arith.mulf %54, %58 : vector<10x32xf32>
    %60 = vector.broadcast %10 : vector<1x32xf32> to vector<10x32xf32>
    %61 = arith.mulf %59, %60 : vector<10x32xf32>
    %62 = vector.broadcast %11 : vector<1x32xf32> to vector<10x32xf32>
    %63 = arith.addf %61, %62 : vector<10x32xf32>
    %cst_39 = arith.constant dense<0.000000e+00> : vector<10x32xf32>
    %64 = tpu.matmul %63, %1, %cst_39 {dimension_numbers = #tpu.dot_dimension_numbers<[1], [0], [0], [1], [0, 0, 1, 1], [], []>} : vector<10x32xf32>, vector<32x32xf32>, vector<10x32xf32> -> vector<10x32xf32>
    %65 = vector.broadcast %12 : vector<1x32xf32> to vector<10x32xf32>
    %66 = arith.addf %64, %65 : vector<10x32xf32>
    %cst_40 = arith.constant dense<0.000000e+00> : vector<10x32xf32>
    %67 = tpu.matmul %63, %2, %cst_40 {dimension_numbers = #tpu.dot_dimension_numbers<[1], [0], [0], [1], [0, 0, 1, 1], [], []>} : vector<10x32xf32>, vector<32x32xf32>, vector<10x32xf32> -> vector<10x32xf32>
    %68 = vector.broadcast %13 : vector<1x32xf32> to vector<10x32xf32>
    %69 = arith.addf %67, %68 : vector<10x32xf32>
    %cst_41 = arith.constant dense<0.000000e+00> : vector<10x32xf32>
    %70 = tpu.matmul %63, %3, %cst_41 {dimension_numbers = #tpu.dot_dimension_numbers<[1], [0], [0], [1], [0, 0, 1, 1], [], []>} : vector<10x32xf32>, vector<32x32xf32>, vector<10x32xf32> -> vector<10x32xf32>
    %71 = vector.broadcast %14 : vector<1x32xf32> to vector<10x32xf32>
    %72 = arith.addf %70, %71 : vector<10x32xf32>
    %cst_42 = arith.constant 0.000000e+00 : f32
    %73 = vector.broadcast %cst_42 : f32 to vector<10x32xf32>
    %74 = vector.broadcast %15 : vector<1x32xf32> to vector<10x32xf32>
    %75 = arith.addf %73, %74 : vector<10x32xf32>
    %76 = vector.extract_strided_slice %66 {offsets = [0, 0], sizes = [10, 8], strides = [1, 1]} : vector<10x32xf32> to vector<10x8xf32>
    %77 = vector.extract_strided_slice %69 {offsets = [0, 0], sizes = [10, 8], strides = [1, 1]} : vector<10x32xf32> to vector<10x8xf32>
    %cst_43 = arith.constant dense<0.000000e+00> : vector<10x10xf32>
    %78 = tpu.matmul %76, %77, %cst_43 {dimension_numbers = #tpu.dot_dimension_numbers<[1], [1], [0], [0], [0, 0, 1, 0], [], []>} : vector<10x8xf32>, vector<10x8xf32>, vector<10x10xf32> -> vector<10x10xf32>
    %cst_44 = arith.constant 0.353553385 : f32
    %79 = vector.broadcast %cst_44 : f32 to vector<10x10xf32>
    %80 = arith.mulf %78, %79 : vector<10x10xf32>
    %81 = arith.addf %80, %41 : vector<10x10xf32>
    %cst_45 = arith.constant dense<0xFF800000> : vector<10xf32>
    %82 = vector.multi_reduction <maximumf>, %81, %cst_45 [1] : vector<10x10xf32> to vector<10xf32>
    %83 = vector.shape_cast %82 : vector<10xf32> to vector<10x1xf32>
    %84 = vector.broadcast %83 : vector<10x1xf32> to vector<10x10xf32>
    %85 = arith.subf %81, %84 : vector<10x10xf32>
    %86 = math.exp %85 : vector<10x10xf32>
    %cst_46 = arith.constant dense<0.000000e+00> : vector<10xf32>
    %87 = vector.multi_reduction <add>, %86, %cst_46 [1] : vector<10x10xf32> to vector<10xf32>
    %88 = vector.shape_cast %87 : vector<10xf32> to vector<10x1xf32>
    %89 = tpu.reciprocal %88 {approx = true} : vector<10x1xf32> -> vector<10x1xf32>
    %90 = vector.broadcast %89 : vector<10x1xf32> to vector<10x10xf32>
    %91 = arith.mulf %86, %90 : vector<10x10xf32>
    %92 = vector.extract_strided_slice %72 {offsets = [0, 0], sizes = [10, 8], strides = [1, 1]} : vector<10x32xf32> to vector<10x8xf32>
    %cst_47 = arith.constant dense<0.000000e+00> : vector<10x8xf32>
    %93 = tpu.matmul %91, %92, %cst_47 {dimension_numbers = #tpu.dot_dimension_numbers<[1], [0], [0], [1], [0, 0, 1, 1], [], []>} : vector<10x10xf32>, vector<10x8xf32>, vector<10x8xf32> -> vector<10x8xf32>
    %94 = vector.extract_strided_slice %4 {offsets = [0, 0], sizes = [8, 32], strides = [1, 1]} : vector<32x32xf32> to vector<8x32xf32>
    %cst_48 = arith.constant dense<0.000000e+00> : vector<10x32xf32>
    %95 = tpu.matmul %93, %94, %cst_48 {dimension_numbers = #tpu.dot_dimension_numbers<[1], [0], [0], [1], [0, 0, 1, 1], [], []>} : vector<10x8xf32>, vector<8x32xf32>, vector<10x32xf32> -> vector<10x32xf32>
    %96 = arith.addf %75, %95 : vector<10x32xf32>
    %97 = vector.extract_strided_slice %66 {offsets = [0, 8], sizes = [10, 8], strides = [1, 1]} : vector<10x32xf32> to vector<10x8xf32>
    %98 = vector.extract_strided_slice %69 {offsets = [0, 8], sizes = [10, 8], strides = [1, 1]} : vector<10x32xf32> to vector<10x8xf32>
    %cst_49 = arith.constant dense<0.000000e+00> : vector<10x10xf32>
    %99 = tpu.matmul %97, %98, %cst_49 {dimension_numbers = #tpu.dot_dimension_numbers<[1], [1], [0], [0], [0, 0, 1, 0], [], []>} : vector<10x8xf32>, vector<10x8xf32>, vector<10x10xf32> -> vector<10x10xf32>
    %cst_50 = arith.constant 0.353553385 : f32
    %100 = vector.broadcast %cst_50 : f32 to vector<10x10xf32>
    %101 = arith.mulf %99, %100 : vector<10x10xf32>
    %102 = arith.addf %101, %41 : vector<10x10xf32>
    %cst_51 = arith.constant dense<0xFF800000> : vector<10xf32>
    %103 = vector.multi_reduction <maximumf>, %102, %cst_51 [1] : vector<10x10xf32> to vector<10xf32>
    %104 = vector.shape_cast %103 : vector<10xf32> to vector<10x1xf32>
    %105 = vector.broadcast %104 : vector<10x1xf32> to vector<10x10xf32>
    %106 = arith.subf %102, %105 : vector<10x10xf32>
    %107 = math.exp %106 : vector<10x10xf32>
    %cst_52 = arith.constant dense<0.000000e+00> : vector<10xf32>
    %108 = vector.multi_reduction <add>, %107, %cst_52 [1] : vector<10x10xf32> to vector<10xf32>
    %109 = vector.shape_cast %108 : vector<10xf32> to vector<10x1xf32>
    %110 = tpu.reciprocal %109 {approx = true} : vector<10x1xf32> -> vector<10x1xf32>
    %111 = vector.broadcast %110 : vector<10x1xf32> to vector<10x10xf32>
    %112 = arith.mulf %107, %111 : vector<10x10xf32>
    %113 = vector.extract_strided_slice %72 {offsets = [0, 8], sizes = [10, 8], strides = [1, 1]} : vector<10x32xf32> to vector<10x8xf32>
    %cst_53 = arith.constant dense<0.000000e+00> : vector<10x8xf32>
    %114 = tpu.matmul %112, %113, %cst_53 {dimension_numbers = #tpu.dot_dimension_numbers<[1], [0], [0], [1], [0, 0, 1, 1], [], []>} : vector<10x10xf32>, vector<10x8xf32>, vector<10x8xf32> -> vector<10x8xf32>
    %115 = vector.extract_strided_slice %4 {offsets = [8, 0], sizes = [8, 32], strides = [1, 1]} : vector<32x32xf32> to vector<8x32xf32>
    %cst_54 = arith.constant dense<0.000000e+00> : vector<10x32xf32>
    %116 = tpu.matmul %114, %115, %cst_54 {dimension_numbers = #tpu.dot_dimension_numbers<[1], [0], [0], [1], [0, 0, 1, 1], [], []>} : vector<10x8xf32>, vector<8x32xf32>, vector<10x32xf32> -> vector<10x32xf32>
    %117 = arith.addf %96, %116 : vector<10x32xf32>
    %118 = vector.extract_strided_slice %66 {offsets = [0, 16], sizes = [10, 8], strides = [1, 1]} : vector<10x32xf32> to vector<10x8xf32>
    %119 = vector.extract_strided_slice %69 {offsets = [0, 16], sizes = [10, 8], strides = [1, 1]} : vector<10x32xf32> to vector<10x8xf32>
    %cst_55 = arith.constant dense<0.000000e+00> : vector<10x10xf32>
    %120 = tpu.matmul %118, %119, %cst_55 {dimension_numbers = #tpu.dot_dimension_numbers<[1], [1], [0], [0], [0, 0, 1, 0], [], []>} : vector<10x8xf32>, vector<10x8xf32>, vector<10x10xf32> -> vector<10x10xf32>
    %cst_56 = arith.constant 0.353553385 : f32
    %121 = vector.broadcast %cst_56 : f32 to vector<10x10xf32>
    %122 = arith.mulf %120, %121 : vector<10x10xf32>
    %123 = arith.addf %122, %41 : vector<10x10xf32>
    %cst_57 = arith.constant dense<0xFF800000> : vector<10xf32>
    %124 = vector.multi_reduction <maximumf>, %123, %cst_57 [1] : vector<10x10xf32> to vector<10xf32>
    %125 = vector.shape_cast %124 : vector<10xf32> to vector<10x1xf32>
    %126 = vector.broadcast %125 : vector<10x1xf32> to vector<10x10xf32>
    %127 = arith.subf %123, %126 : vector<10x10xf32>
    %128 = math.exp %127 : vector<10x10xf32>
    %cst_58 = arith.constant dense<0.000000e+00> : vector<10xf32>
    %129 = vector.multi_reduction <add>, %128, %cst_58 [1] : vector<10x10xf32> to vector<10xf32>
    %130 = vector.shape_cast %129 : vector<10xf32> to vector<10x1xf32>
    %131 = tpu.reciprocal %130 {approx = true} : vector<10x1xf32> -> vector<10x1xf32>
    %132 = vector.broadcast %131 : vector<10x1xf32> to vector<10x10xf32>
    %133 = arith.mulf %128, %132 : vector<10x10xf32>
    %134 = vector.extract_strided_slice %72 {offsets = [0, 16], sizes = [10, 8], strides = [1, 1]} : vector<10x32xf32> to vector<10x8xf32>
    %cst_59 = arith.constant dense<0.000000e+00> : vector<10x8xf32>
    %135 = tpu.matmul %133, %134, %cst_59 {dimension_numbers = #tpu.dot_dimension_numbers<[1], [0], [0], [1], [0, 0, 1, 1], [], []>} : vector<10x10xf32>, vector<10x8xf32>, vector<10x8xf32> -> vector<10x8xf32>
    %136 = vector.extract_strided_slice %4 {offsets = [16, 0], sizes = [8, 32], strides = [1, 1]} : vector<32x32xf32> to vector<8x32xf32>
    %cst_60 = arith.constant dense<0.000000e+00> : vector<10x32xf32>
    %137 = tpu.matmul %135, %136, %cst_60 {dimension_numbers = #tpu.dot_dimension_numbers<[1], [0], [0], [1], [0, 0, 1, 1], [], []>} : vector<10x8xf32>, vector<8x32xf32>, vector<10x32xf32> -> vector<10x32xf32>
    %138 = arith.addf %117, %137 : vector<10x32xf32>
    %139 = vector.extract_strided_slice %66 {offsets = [0, 24], sizes = [10, 8], strides = [1, 1]} : vector<10x32xf32> to vector<10x8xf32>
    %140 = vector.extract_strided_slice %69 {offsets = [0, 24], sizes = [10, 8], strides = [1, 1]} : vector<10x32xf32> to vector<10x8xf32>
    %cst_61 = arith.constant dense<0.000000e+00> : vector<10x10xf32>
    %141 = tpu.matmul %139, %140, %cst_61 {dimension_numbers = #tpu.dot_dimension_numbers<[1], [1], [0], [0], [0, 0, 1, 0], [], []>} : vector<10x8xf32>, vector<10x8xf32>, vector<10x10xf32> -> vector<10x10xf32>
    %cst_62 = arith.constant 0.353553385 : f32
    %142 = vector.broadcast %cst_62 : f32 to vector<10x10xf32>
    %143 = arith.mulf %141, %142 : vector<10x10xf32>
    %144 = arith.addf %143, %41 : vector<10x10xf32>
    %cst_63 = arith.constant dense<0xFF800000> : vector<10xf32>
    %145 = vector.multi_reduction <maximumf>, %144, %cst_63 [1] : vector<10x10xf32> to vector<10xf32>
    %146 = vector.shape_cast %145 : vector<10xf32> to vector<10x1xf32>
    %147 = vector.broadcast %146 : vector<10x1xf32> to vector<10x10xf32>
    %148 = arith.subf %144, %147 : vector<10x10xf32>
    %149 = math.exp %148 : vector<10x10xf32>
    %cst_64 = arith.constant dense<0.000000e+00> : vector<10xf32>
    %150 = vector.multi_reduction <add>, %149, %cst_64 [1] : vector<10x10xf32> to vector<10xf32>
    %151 = vector.shape_cast %150 : vector<10xf32> to vector<10x1xf32>
    %152 = tpu.reciprocal %151 {approx = true} : vector<10x1xf32> -> vector<10x1xf32>
    %153 = vector.broadcast %152 : vector<10x1xf32> to vector<10x10xf32>
    %154 = arith.mulf %149, %153 : vector<10x10xf32>
    %155 = vector.extract_strided_slice %72 {offsets = [0, 24], sizes = [10, 8], strides = [1, 1]} : vector<10x32xf32> to vector<10x8xf32>
    %cst_65 = arith.constant dense<0.000000e+00> : vector<10x8xf32>
    %156 = tpu.matmul %154, %155, %cst_65 {dimension_numbers = #tpu.dot_dimension_numbers<[1], [0], [0], [1], [0, 0, 1, 1], [], []>} : vector<10x10xf32>, vector<10x8xf32>, vector<10x8xf32> -> vector<10x8xf32>
    %157 = vector.extract_strided_slice %4 {offsets = [24, 0], sizes = [8, 32], strides = [1, 1]} : vector<32x32xf32> to vector<8x32xf32>
    %cst_66 = arith.constant dense<0.000000e+00> : vector<10x32xf32>
    %158 = tpu.matmul %156, %157, %cst_66 {dimension_numbers = #tpu.dot_dimension_numbers<[1], [0], [0], [1], [0, 0, 1, 1], [], []>} : vector<10x8xf32>, vector<8x32xf32>, vector<10x32xf32> -> vector<10x32xf32>
    %159 = arith.addf %138, %158 : vector<10x32xf32>
    %160 = arith.addf %40, %159 : vector<10x32xf32>
    %cst_67 = arith.constant dense<0.000000e+00> : vector<10xf32>
    %161 = vector.multi_reduction <add>, %160, %cst_67 [1] : vector<10x32xf32> to vector<10xf32>
    %162 = vector.shape_cast %161 : vector<10xf32> to vector<10x1xf32>
    %cst_68 = arith.constant 3.200000e+01 : f32
    %163 = vector.broadcast %cst_68 : f32 to vector<10x1xf32>
    %164 = arith.divf %162, %163 : vector<10x1xf32>
    %165 = vector.broadcast %164 : vector<10x1xf32> to vector<10x32xf32>
    %166 = arith.subf %160, %165 : vector<10x32xf32>
    %167 = arith.mulf %166, %166 : vector<10x32xf32>
    %cst_69 = arith.constant dense<0.000000e+00> : vector<10xf32>
    %168 = vector.multi_reduction <add>, %167, %cst_69 [1] : vector<10x32xf32> to vector<10xf32>
    %169 = vector.shape_cast %168 : vector<10xf32> to vector<10x1xf32>
    %cst_70 = arith.constant 3.200000e+01 : f32
    %170 = vector.broadcast %cst_70 : f32 to vector<10x1xf32>
    %171 = arith.divf %169, %170 : vector<10x1xf32>
    %172 = vector.broadcast %164 : vector<10x1xf32> to vector<10x32xf32>
    %173 = arith.subf %160, %172 : vector<10x32xf32>
    %cst_71 = arith.constant 9.99999974E-6 : f32
    %174 = vector.broadcast %cst_71 : f32 to vector<10x1xf32>
    %175 = arith.addf %171, %174 : vector<10x1xf32>
    %176 = math.rsqrt %175 : vector<10x1xf32>
    %177 = vector.broadcast %176 : vector<10x1xf32> to vector<10x32xf32>
    %178 = arith.mulf %173, %177 : vector<10x32xf32>
    %179 = vector.broadcast %16 : vector<1x32xf32> to vector<10x32xf32>
    %180 = arith.mulf %178, %179 : vector<10x32xf32>
    %181 = vector.broadcast %17 : vector<1x32xf32> to vector<10x32xf32>
    %182 = arith.addf %180, %181 : vector<10x32xf32>
    %cst_72 = arith.constant dense<0.000000e+00> : vector<10x128xf32>
    %183 = tpu.matmul %182, %6, %cst_72 {dimension_numbers = #tpu.dot_dimension_numbers<[1], [0], [0], [1], [0, 0, 1, 1], [], []>} : vector<10x32xf32>, vector<32x128xf32>, vector<10x128xf32> -> vector<10x128xf32>
    %184 = vector.broadcast %21 : vector<1x128xf32> to vector<10x128xf32>
    %185 = arith.addf %183, %184 : vector<10x128xf32>
    %cst_73 = arith.constant 5.000000e-01 : f32
    %186 = vector.broadcast %cst_73 : f32 to vector<10x128xf32>
    %187 = arith.mulf %186, %185 : vector<10x128xf32>
    %cst_74 = arith.constant 0.707106769 : f32
    %188 = vector.broadcast %cst_74 : f32 to vector<10x128xf32>
    %189 = arith.mulf %185, %188 : vector<10x128xf32>
    %190 = math.absf %189 : vector<10x128xf32>
    %cst_75 = arith.constant 0.327591091 : f32
    %191 = vector.broadcast %cst_75 : f32 to vector<10x128xf32>
    %192 = arith.mulf %191, %190 : vector<10x128xf32>
    %cst_76 = arith.constant 1.000000e+00 : f32
    %193 = vector.broadcast %cst_76 : f32 to vector<10x128xf32>
    %194 = arith.addf %193, %192 : vector<10x128xf32>
    %cst_77 = arith.constant 1.000000e+00 : f32
    %195 = vector.broadcast %cst_77 : f32 to vector<10x128xf32>
    %196 = arith.divf %195, %194 : vector<10x128xf32>
    %cst_78 = arith.constant 1.06140542 : f32
    %197 = vector.broadcast %cst_78 : f32 to vector<10x128xf32>
    %198 = arith.mulf %197, %196 : vector<10x128xf32>
    %cst_79 = arith.constant -1.45315206 : f32
    %199 = vector.broadcast %cst_79 : f32 to vector<10x128xf32>
    %200 = arith.addf %198, %199 : vector<10x128xf32>
    %201 = arith.mulf %200, %196 : vector<10x128xf32>
    %cst_80 = arith.constant 1.42141378 : f32
    %202 = vector.broadcast %cst_80 : f32 to vector<10x128xf32>
    %203 = arith.addf %201, %202 : vector<10x128xf32>
    %204 = arith.mulf %203, %196 : vector<10x128xf32>
    %cst_81 = arith.constant -0.284496725 : f32
    %205 = vector.broadcast %cst_81 : f32 to vector<10x128xf32>
    %206 = arith.addf %204, %205 : vector<10x128xf32>
    %207 = arith.mulf %206, %196 : vector<10x128xf32>
    %cst_82 = arith.constant 0.254829586 : f32
    %208 = vector.broadcast %cst_82 : f32 to vector<10x128xf32>
    %209 = arith.addf %207, %208 : vector<10x128xf32>
    %210 = arith.mulf %209, %196 : vector<10x128xf32>
    %cst_83 = arith.constant 0.000000e+00 : f32
    %211 = vector.broadcast %cst_83 : f32 to vector<10x128xf32>
    %212 = arith.subf %211, %190 : vector<10x128xf32>
    %213 = arith.mulf %212, %190 : vector<10x128xf32>
    %214 = math.exp %213 : vector<10x128xf32>
    %215 = arith.mulf %210, %214 : vector<10x128xf32>
    %cst_84 = arith.constant 1.000000e+00 : f32
    %216 = vector.broadcast %cst_84 : f32 to vector<10x128xf32>
    %217 = arith.subf %216, %215 : vector<10x128xf32>
    %cst_85 = arith.constant 0.000000e+00 : f32
    %218 = vector.broadcast %cst_85 : f32 to vector<10x128xf32>
    %219 = arith.cmpf oge, %189, %218 : vector<10x128xf32>
    %cst_86 = arith.constant 0.000000e+00 : f32
    %220 = vector.broadcast %cst_86 : f32 to vector<10x128xf32>
    %221 = arith.subf %220, %217 : vector<10x128xf32>
    %222 = arith.select %219, %217, %221 : vector<10x128xi1>, vector<10x128xf32>
    %cst_87 = arith.constant 1.000000e+00 : f32
    %223 = vector.broadcast %cst_87 : f32 to vector<10x128xf32>
    %224 = arith.addf %223, %222 : vector<10x128xf32>
    %225 = arith.mulf %187, %224 : vector<10x128xf32>
    %cst_88 = arith.constant dense<0.000000e+00> : vector<10x32xf32>
    %226 = tpu.matmul %225, %5, %cst_88 {dimension_numbers = #tpu.dot_dimension_numbers<[1], [0], [0], [1], [0, 0, 1, 1], [], []>} : vector<10x128xf32>, vector<128x32xf32>, vector<10x32xf32> -> vector<10x32xf32>
    %227 = vector.broadcast %18 : vector<1x32xf32> to vector<10x32xf32>
    %228 = arith.addf %226, %227 : vector<10x32xf32>
    %229 = arith.addf %160, %228 : vector<10x32xf32>
    %cst_89 = arith.constant dense<0.000000e+00> : vector<10xf32>
    %230 = vector.multi_reduction <add>, %229, %cst_89 [1] : vector<10x32xf32> to vector<10xf32>
    %231 = vector.shape_cast %230 : vector<10xf32> to vector<10x1xf32>
    %cst_90 = arith.constant 3.200000e+01 : f32
    %232 = vector.broadcast %cst_90 : f32 to vector<10x1xf32>
    %233 = arith.divf %231, %232 : vector<10x1xf32>
    %234 = vector.broadcast %233 : vector<10x1xf32> to vector<10x32xf32>
    %235 = arith.subf %229, %234 : vector<10x32xf32>
    %236 = arith.mulf %235, %235 : vector<10x32xf32>
    %cst_91 = arith.constant dense<0.000000e+00> : vector<10xf32>
    %237 = vector.multi_reduction <add>, %236, %cst_91 [1] : vector<10x32xf32> to vector<10xf32>
    %238 = vector.shape_cast %237 : vector<10xf32> to vector<10x1xf32>
    %cst_92 = arith.constant 3.200000e+01 : f32
    %239 = vector.broadcast %cst_92 : f32 to vector<10x1xf32>
    %240 = arith.divf %238, %239 : vector<10x1xf32>
    %241 = vector.broadcast %233 : vector<10x1xf32> to vector<10x32xf32>
    %242 = arith.subf %229, %241 : vector<10x32xf32>
    %cst_93 = arith.constant 9.99999974E-6 : f32
    %243 = vector.broadcast %cst_93 : f32 to vector<10x1xf32>
    %244 = arith.addf %240, %243 : vector<10x1xf32>
    %245 = math.rsqrt %244 : vector<10x1xf32>
    %246 = vector.broadcast %245 : vector<10x1xf32> to vector<10x32xf32>
    %247 = arith.mulf %242, %246 : vector<10x32xf32>
    %248 = vector.broadcast %10 : vector<1x32xf32> to vector<10x32xf32>
    %249 = arith.mulf %247, %248 : vector<10x32xf32>
    %250 = vector.broadcast %11 : vector<1x32xf32> to vector<10x32xf32>
    %251 = arith.addf %249, %250 : vector<10x32xf32>
    %cst_94 = arith.constant dense<0.000000e+00> : vector<10x32xf32>
    %252 = tpu.matmul %251, %1, %cst_94 {dimension_numbers = #tpu.dot_dimension_numbers<[1], [0], [0], [1], [0, 0, 1, 1], [], []>} : vector<10x32xf32>, vector<32x32xf32>, vector<10x32xf32> -> vector<10x32xf32>
    %253 = vector.broadcast %12 : vector<1x32xf32> to vector<10x32xf32>
    %254 = arith.addf %252, %253 : vector<10x32xf32>
    %cst_95 = arith.constant dense<0.000000e+00> : vector<10x32xf32>
    %255 = tpu.matmul %251, %2, %cst_95 {dimension_numbers = #tpu.dot_dimension_numbers<[1], [0], [0], [1], [0, 0, 1, 1], [], []>} : vector<10x32xf32>, vector<32x32xf32>, vector<10x32xf32> -> vector<10x32xf32>
    %256 = vector.broadcast %13 : vector<1x32xf32> to vector<10x32xf32>
    %257 = arith.addf %255, %256 : vector<10x32xf32>
    %cst_96 = arith.constant dense<0.000000e+00> : vector<10x32xf32>
    %258 = tpu.matmul %251, %3, %cst_96 {dimension_numbers = #tpu.dot_dimension_numbers<[1], [0], [0], [1], [0, 0, 1, 1], [], []>} : vector<10x32xf32>, vector<32x32xf32>, vector<10x32xf32> -> vector<10x32xf32>
    %259 = vector.broadcast %14 : vector<1x32xf32> to vector<10x32xf32>
    %260 = arith.addf %258, %259 : vector<10x32xf32>
    %cst_97 = arith.constant 0.000000e+00 : f32
    %261 = vector.broadcast %cst_97 : f32 to vector<10x32xf32>
    %262 = vector.broadcast %15 : vector<1x32xf32> to vector<10x32xf32>
    %263 = arith.addf %261, %262 : vector<10x32xf32>
    %264 = vector.extract_strided_slice %254 {offsets = [0, 0], sizes = [10, 8], strides = [1, 1]} : vector<10x32xf32> to vector<10x8xf32>
    %265 = vector.extract_strided_slice %257 {offsets = [0, 0], sizes = [10, 8], strides = [1, 1]} : vector<10x32xf32> to vector<10x8xf32>
    %cst_98 = arith.constant dense<0.000000e+00> : vector<10x10xf32>
    %266 = tpu.matmul %264, %265, %cst_98 {dimension_numbers = #tpu.dot_dimension_numbers<[1], [1], [0], [0], [0, 0, 1, 0], [], []>} : vector<10x8xf32>, vector<10x8xf32>, vector<10x10xf32> -> vector<10x10xf32>
    %cst_99 = arith.constant 0.353553385 : f32
    %267 = vector.broadcast %cst_99 : f32 to vector<10x10xf32>
    %268 = arith.mulf %266, %267 : vector<10x10xf32>
    %269 = arith.addf %268, %41 : vector<10x10xf32>
    %cst_100 = arith.constant dense<0xFF800000> : vector<10xf32>
    %270 = vector.multi_reduction <maximumf>, %269, %cst_100 [1] : vector<10x10xf32> to vector<10xf32>
    %271 = vector.shape_cast %270 : vector<10xf32> to vector<10x1xf32>
    %272 = vector.broadcast %271 : vector<10x1xf32> to vector<10x10xf32>
    %273 = arith.subf %269, %272 : vector<10x10xf32>
    %274 = math.exp %273 : vector<10x10xf32>
    %cst_101 = arith.constant dense<0.000000e+00> : vector<10xf32>
    %275 = vector.multi_reduction <add>, %274, %cst_101 [1] : vector<10x10xf32> to vector<10xf32>
    %276 = vector.shape_cast %275 : vector<10xf32> to vector<10x1xf32>
    %277 = tpu.reciprocal %276 {approx = true} : vector<10x1xf32> -> vector<10x1xf32>
    %278 = vector.broadcast %277 : vector<10x1xf32> to vector<10x10xf32>
    %279 = arith.mulf %274, %278 : vector<10x10xf32>
    %280 = vector.extract_strided_slice %260 {offsets = [0, 0], sizes = [10, 8], strides = [1, 1]} : vector<10x32xf32> to vector<10x8xf32>
    %cst_102 = arith.constant dense<0.000000e+00> : vector<10x8xf32>
    %281 = tpu.matmul %279, %280, %cst_102 {dimension_numbers = #tpu.dot_dimension_numbers<[1], [0], [0], [1], [0, 0, 1, 1], [], []>} : vector<10x10xf32>, vector<10x8xf32>, vector<10x8xf32> -> vector<10x8xf32>
    %282 = vector.extract_strided_slice %4 {offsets = [0, 0], sizes = [8, 32], strides = [1, 1]} : vector<32x32xf32> to vector<8x32xf32>
    %cst_103 = arith.constant dense<0.000000e+00> : vector<10x32xf32>
    %283 = tpu.matmul %281, %282, %cst_103 {dimension_numbers = #tpu.dot_dimension_numbers<[1], [0], [0], [1], [0, 0, 1, 1], [], []>} : vector<10x8xf32>, vector<8x32xf32>, vector<10x32xf32> -> vector<10x32xf32>
    %284 = arith.addf %263, %283 : vector<10x32xf32>
    %285 = vector.extract_strided_slice %254 {offsets = [0, 8], sizes = [10, 8], strides = [1, 1]} : vector<10x32xf32> to vector<10x8xf32>
    %286 = vector.extract_strided_slice %257 {offsets = [0, 8], sizes = [10, 8], strides = [1, 1]} : vector<10x32xf32> to vector<10x8xf32>
    %cst_104 = arith.constant dense<0.000000e+00> : vector<10x10xf32>
    %287 = tpu.matmul %285, %286, %cst_104 {dimension_numbers = #tpu.dot_dimension_numbers<[1], [1], [0], [0], [0, 0, 1, 0], [], []>} : vector<10x8xf32>, vector<10x8xf32>, vector<10x10xf32> -> vector<10x10xf32>
    %cst_105 = arith.constant 0.353553385 : f32
    %288 = vector.broadcast %cst_105 : f32 to vector<10x10xf32>
    %289 = arith.mulf %287, %288 : vector<10x10xf32>
    %290 = arith.addf %289, %41 : vector<10x10xf32>
    %cst_106 = arith.constant dense<0xFF800000> : vector<10xf32>
    %291 = vector.multi_reduction <maximumf>, %290, %cst_106 [1] : vector<10x10xf32> to vector<10xf32>
    %292 = vector.shape_cast %291 : vector<10xf32> to vector<10x1xf32>
    %293 = vector.broadcast %292 : vector<10x1xf32> to vector<10x10xf32>
    %294 = arith.subf %290, %293 : vector<10x10xf32>
    %295 = math.exp %294 : vector<10x10xf32>
    %cst_107 = arith.constant dense<0.000000e+00> : vector<10xf32>
    %296 = vector.multi_reduction <add>, %295, %cst_107 [1] : vector<10x10xf32> to vector<10xf32>
    %297 = vector.shape_cast %296 : vector<10xf32> to vector<10x1xf32>
    %298 = tpu.reciprocal %297 {approx = true} : vector<10x1xf32> -> vector<10x1xf32>
    %299 = vector.broadcast %298 : vector<10x1xf32> to vector<10x10xf32>
    %300 = arith.mulf %295, %299 : vector<10x10xf32>
    %301 = vector.extract_strided_slice %260 {offsets = [0, 8], sizes = [10, 8], strides = [1, 1]} : vector<10x32xf32> to vector<10x8xf32>
    %cst_108 = arith.constant dense<0.000000e+00> : vector<10x8xf32>
    %302 = tpu.matmul %300, %301, %cst_108 {dimension_numbers = #tpu.dot_dimension_numbers<[1], [0], [0], [1], [0, 0, 1, 1], [], []>} : vector<10x10xf32>, vector<10x8xf32>, vector<10x8xf32> -> vector<10x8xf32>
    %303 = vector.extract_strided_slice %4 {offsets = [8, 0], sizes = [8, 32], strides = [1, 1]} : vector<32x32xf32> to vector<8x32xf32>
    %cst_109 = arith.constant dense<0.000000e+00> : vector<10x32xf32>
    %304 = tpu.matmul %302, %303, %cst_109 {dimension_numbers = #tpu.dot_dimension_numbers<[1], [0], [0], [1], [0, 0, 1, 1], [], []>} : vector<10x8xf32>, vector<8x32xf32>, vector<10x32xf32> -> vector<10x32xf32>
    %305 = arith.addf %284, %304 : vector<10x32xf32>
    %306 = vector.extract_strided_slice %254 {offsets = [0, 16], sizes = [10, 8], strides = [1, 1]} : vector<10x32xf32> to vector<10x8xf32>
    %307 = vector.extract_strided_slice %257 {offsets = [0, 16], sizes = [10, 8], strides = [1, 1]} : vector<10x32xf32> to vector<10x8xf32>
    %cst_110 = arith.constant dense<0.000000e+00> : vector<10x10xf32>
    %308 = tpu.matmul %306, %307, %cst_110 {dimension_numbers = #tpu.dot_dimension_numbers<[1], [1], [0], [0], [0, 0, 1, 0], [], []>} : vector<10x8xf32>, vector<10x8xf32>, vector<10x10xf32> -> vector<10x10xf32>
    %cst_111 = arith.constant 0.353553385 : f32
    %309 = vector.broadcast %cst_111 : f32 to vector<10x10xf32>
    %310 = arith.mulf %308, %309 : vector<10x10xf32>
    %311 = arith.addf %310, %41 : vector<10x10xf32>
    %cst_112 = arith.constant dense<0xFF800000> : vector<10xf32>
    %312 = vector.multi_reduction <maximumf>, %311, %cst_112 [1] : vector<10x10xf32> to vector<10xf32>
    %313 = vector.shape_cast %312 : vector<10xf32> to vector<10x1xf32>
    %314 = vector.broadcast %313 : vector<10x1xf32> to vector<10x10xf32>
    %315 = arith.subf %311, %314 : vector<10x10xf32>
    %316 = math.exp %315 : vector<10x10xf32>
    %cst_113 = arith.constant dense<0.000000e+00> : vector<10xf32>
    %317 = vector.multi_reduction <add>, %316, %cst_113 [1] : vector<10x10xf32> to vector<10xf32>
    %318 = vector.shape_cast %317 : vector<10xf32> to vector<10x1xf32>
    %319 = tpu.reciprocal %318 {approx = true} : vector<10x1xf32> -> vector<10x1xf32>
    %320 = vector.broadcast %319 : vector<10x1xf32> to vector<10x10xf32>
    %321 = arith.mulf %316, %320 : vector<10x10xf32>
    %322 = vector.extract_strided_slice %260 {offsets = [0, 16], sizes = [10, 8], strides = [1, 1]} : vector<10x32xf32> to vector<10x8xf32>
    %cst_114 = arith.constant dense<0.000000e+00> : vector<10x8xf32>
    %323 = tpu.matmul %321, %322, %cst_114 {dimension_numbers = #tpu.dot_dimension_numbers<[1], [0], [0], [1], [0, 0, 1, 1], [], []>} : vector<10x10xf32>, vector<10x8xf32>, vector<10x8xf32> -> vector<10x8xf32>
    %324 = vector.extract_strided_slice %4 {offsets = [16, 0], sizes = [8, 32], strides = [1, 1]} : vector<32x32xf32> to vector<8x32xf32>
    %cst_115 = arith.constant dense<0.000000e+00> : vector<10x32xf32>
    %325 = tpu.matmul %323, %324, %cst_115 {dimension_numbers = #tpu.dot_dimension_numbers<[1], [0], [0], [1], [0, 0, 1, 1], [], []>} : vector<10x8xf32>, vector<8x32xf32>, vector<10x32xf32> -> vector<10x32xf32>
    %326 = arith.addf %305, %325 : vector<10x32xf32>
    %327 = vector.extract_strided_slice %254 {offsets = [0, 24], sizes = [10, 8], strides = [1, 1]} : vector<10x32xf32> to vector<10x8xf32>
    %328 = vector.extract_strided_slice %257 {offsets = [0, 24], sizes = [10, 8], strides = [1, 1]} : vector<10x32xf32> to vector<10x8xf32>
    %cst_116 = arith.constant dense<0.000000e+00> : vector<10x10xf32>
    %329 = tpu.matmul %327, %328, %cst_116 {dimension_numbers = #tpu.dot_dimension_numbers<[1], [1], [0], [0], [0, 0, 1, 0], [], []>} : vector<10x8xf32>, vector<10x8xf32>, vector<10x10xf32> -> vector<10x10xf32>
    %cst_117 = arith.constant 0.353553385 : f32
    %330 = vector.broadcast %cst_117 : f32 to vector<10x10xf32>
    %331 = arith.mulf %329, %330 : vector<10x10xf32>
    %332 = arith.addf %331, %41 : vector<10x10xf32>
    %cst_118 = arith.constant dense<0xFF800000> : vector<10xf32>
    %333 = vector.multi_reduction <maximumf>, %332, %cst_118 [1] : vector<10x10xf32> to vector<10xf32>
    %334 = vector.shape_cast %333 : vector<10xf32> to vector<10x1xf32>
    %335 = vector.broadcast %334 : vector<10x1xf32> to vector<10x10xf32>
    %336 = arith.subf %332, %335 : vector<10x10xf32>
    %337 = math.exp %336 : vector<10x10xf32>
    %cst_119 = arith.constant dense<0.000000e+00> : vector<10xf32>
    %338 = vector.multi_reduction <add>, %337, %cst_119 [1] : vector<10x10xf32> to vector<10xf32>
    %339 = vector.shape_cast %338 : vector<10xf32> to vector<10x1xf32>
    %340 = tpu.reciprocal %339 {approx = true} : vector<10x1xf32> -> vector<10x1xf32>
    %341 = vector.broadcast %340 : vector<10x1xf32> to vector<10x10xf32>
    %342 = arith.mulf %337, %341 : vector<10x10xf32>
    %343 = vector.extract_strided_slice %260 {offsets = [0, 24], sizes = [10, 8], strides = [1, 1]} : vector<10x32xf32> to vector<10x8xf32>
    %cst_120 = arith.constant dense<0.000000e+00> : vector<10x8xf32>
    %344 = tpu.matmul %342, %343, %cst_120 {dimension_numbers = #tpu.dot_dimension_numbers<[1], [0], [0], [1], [0, 0, 1, 1], [], []>} : vector<10x10xf32>, vector<10x8xf32>, vector<10x8xf32> -> vector<10x8xf32>
    %345 = vector.extract_strided_slice %4 {offsets = [24, 0], sizes = [8, 32], strides = [1, 1]} : vector<32x32xf32> to vector<8x32xf32>
    %cst_121 = arith.constant dense<0.000000e+00> : vector<10x32xf32>
    %346 = tpu.matmul %344, %345, %cst_121 {dimension_numbers = #tpu.dot_dimension_numbers<[1], [0], [0], [1], [0, 0, 1, 1], [], []>} : vector<10x8xf32>, vector<8x32xf32>, vector<10x32xf32> -> vector<10x32xf32>
    %347 = arith.addf %326, %346 : vector<10x32xf32>
    %348 = arith.addf %229, %347 : vector<10x32xf32>
    %cst_122 = arith.constant dense<0.000000e+00> : vector<10xf32>
    %349 = vector.multi_reduction <add>, %348, %cst_122 [1] : vector<10x32xf32> to vector<10xf32>
    %350 = vector.shape_cast %349 : vector<10xf32> to vector<10x1xf32>
    %cst_123 = arith.constant 3.200000e+01 : f32
    %351 = vector.broadcast %cst_123 : f32 to vector<10x1xf32>
    %352 = arith.divf %350, %351 : vector<10x1xf32>
    %353 = vector.broadcast %352 : vector<10x1xf32> to vector<10x32xf32>
    %354 = arith.subf %348, %353 : vector<10x32xf32>
    %355 = arith.mulf %354, %354 : vector<10x32xf32>
    %cst_124 = arith.constant dense<0.000000e+00> : vector<10xf32>
    %356 = vector.multi_reduction <add>, %355, %cst_124 [1] : vector<10x32xf32> to vector<10xf32>
    %357 = vector.shape_cast %356 : vector<10xf32> to vector<10x1xf32>
    %cst_125 = arith.constant 3.200000e+01 : f32
    %358 = vector.broadcast %cst_125 : f32 to vector<10x1xf32>
    %359 = arith.divf %357, %358 : vector<10x1xf32>
    %360 = vector.broadcast %352 : vector<10x1xf32> to vector<10x32xf32>
    %361 = arith.subf %348, %360 : vector<10x32xf32>
    %cst_126 = arith.constant 9.99999974E-6 : f32
    %362 = vector.broadcast %cst_126 : f32 to vector<10x1xf32>
    %363 = arith.addf %359, %362 : vector<10x1xf32>
    %364 = math.rsqrt %363 : vector<10x1xf32>
    %365 = vector.broadcast %364 : vector<10x1xf32> to vector<10x32xf32>
    %366 = arith.mulf %361, %365 : vector<10x32xf32>
    %367 = vector.broadcast %16 : vector<1x32xf32> to vector<10x32xf32>
    %368 = arith.mulf %366, %367 : vector<10x32xf32>
    %369 = vector.broadcast %17 : vector<1x32xf32> to vector<10x32xf32>
    %370 = arith.addf %368, %369 : vector<10x32xf32>
    %cst_127 = arith.constant dense<0.000000e+00> : vector<10x128xf32>
    %371 = tpu.matmul %370, %6, %cst_127 {dimension_numbers = #tpu.dot_dimension_numbers<[1], [0], [0], [1], [0, 0, 1, 1], [], []>} : vector<10x32xf32>, vector<32x128xf32>, vector<10x128xf32> -> vector<10x128xf32>
    %372 = vector.broadcast %21 : vector<1x128xf32> to vector<10x128xf32>
    %373 = arith.addf %371, %372 : vector<10x128xf32>
    %cst_128 = arith.constant 5.000000e-01 : f32
    %374 = vector.broadcast %cst_128 : f32 to vector<10x128xf32>
    %375 = arith.mulf %374, %373 : vector<10x128xf32>
    %cst_129 = arith.constant 0.707106769 : f32
    %376 = vector.broadcast %cst_129 : f32 to vector<10x128xf32>
    %377 = arith.mulf %373, %376 : vector<10x128xf32>
    %378 = math.absf %377 : vector<10x128xf32>
    %cst_130 = arith.constant 0.327591091 : f32
    %379 = vector.broadcast %cst_130 : f32 to vector<10x128xf32>
    %380 = arith.mulf %379, %378 : vector<10x128xf32>
    %cst_131 = arith.constant 1.000000e+00 : f32
    %381 = vector.broadcast %cst_131 : f32 to vector<10x128xf32>
    %382 = arith.addf %381, %380 : vector<10x128xf32>
    %cst_132 = arith.constant 1.000000e+00 : f32
    %383 = vector.broadcast %cst_132 : f32 to vector<10x128xf32>
    %384 = arith.divf %383, %382 : vector<10x128xf32>
    %cst_133 = arith.constant 1.06140542 : f32
    %385 = vector.broadcast %cst_133 : f32 to vector<10x128xf32>
    %386 = arith.mulf %385, %384 : vector<10x128xf32>
    %cst_134 = arith.constant -1.45315206 : f32
    %387 = vector.broadcast %cst_134 : f32 to vector<10x128xf32>
    %388 = arith.addf %386, %387 : vector<10x128xf32>
    %389 = arith.mulf %388, %384 : vector<10x128xf32>
    %cst_135 = arith.constant 1.42141378 : f32
    %390 = vector.broadcast %cst_135 : f32 to vector<10x128xf32>
    %391 = arith.addf %389, %390 : vector<10x128xf32>
    %392 = arith.mulf %391, %384 : vector<10x128xf32>
    %cst_136 = arith.constant -0.284496725 : f32
    %393 = vector.broadcast %cst_136 : f32 to vector<10x128xf32>
    %394 = arith.addf %392, %393 : vector<10x128xf32>
    %395 = arith.mulf %394, %384 : vector<10x128xf32>
    %cst_137 = arith.constant 0.254829586 : f32
    %396 = vector.broadcast %cst_137 : f32 to vector<10x128xf32>
    %397 = arith.addf %395, %396 : vector<10x128xf32>
    %398 = arith.mulf %397, %384 : vector<10x128xf32>
    %cst_138 = arith.constant 0.000000e+00 : f32
    %399 = vector.broadcast %cst_138 : f32 to vector<10x128xf32>
    %400 = arith.subf %399, %378 : vector<10x128xf32>
    %401 = arith.mulf %400, %378 : vector<10x128xf32>
    %402 = math.exp %401 : vector<10x128xf32>
    %403 = arith.mulf %398, %402 : vector<10x128xf32>
    %cst_139 = arith.constant 1.000000e+00 : f32
    %404 = vector.broadcast %cst_139 : f32 to vector<10x128xf32>
    %405 = arith.subf %404, %403 : vector<10x128xf32>
    %cst_140 = arith.constant 0.000000e+00 : f32
    %406 = vector.broadcast %cst_140 : f32 to vector<10x128xf32>
    %407 = arith.cmpf oge, %377, %406 : vector<10x128xf32>
    %cst_141 = arith.constant 0.000000e+00 : f32
    %408 = vector.broadcast %cst_141 : f32 to vector<10x128xf32>
    %409 = arith.subf %408, %405 : vector<10x128xf32>
    %410 = arith.select %407, %405, %409 : vector<10x128xi1>, vector<10x128xf32>
    %cst_142 = arith.constant 1.000000e+00 : f32
    %411 = vector.broadcast %cst_142 : f32 to vector<10x128xf32>
    %412 = arith.addf %411, %410 : vector<10x128xf32>
    %413 = arith.mulf %375, %412 : vector<10x128xf32>
    %cst_143 = arith.constant dense<0.000000e+00> : vector<10x32xf32>
    %414 = tpu.matmul %413, %5, %cst_143 {dimension_numbers = #tpu.dot_dimension_numbers<[1], [0], [0], [1], [0, 0, 1, 1], [], []>} : vector<10x128xf32>, vector<128x32xf32>, vector<10x32xf32> -> vector<10x32xf32>
    %415 = vector.broadcast %18 : vector<1x32xf32> to vector<10x32xf32>
    %416 = arith.addf %414, %415 : vector<10x32xf32>
    %417 = arith.addf %348, %416 : vector<10x32xf32>
    %418 = vector.extract_strided_slice %417 {offsets = [0, 0], sizes = [1, 32], strides = [1, 1]} : vector<10x32xf32> to vector<1x32xf32>
    %419 = vector.extract_strided_slice %417 {offsets = [5, 0], sizes = [1, 32], strides = [1, 1]} : vector<10x32xf32> to vector<1x32xf32>
    %420 = tpu.concatenate %418, %419 in 0 : vector<1x32xf32>, vector<1x32xf32> -> vector<2x32xf32>
    %cst_144 = arith.constant dense<0.000000e+00> : vector<2xf32>
    %421 = vector.multi_reduction <add>, %420, %cst_144 [1] : vector<2x32xf32> to vector<2xf32>
    %422 = vector.shape_cast %421 : vector<2xf32> to vector<2x1xf32>
    %cst_145 = arith.constant 3.200000e+01 : f32
    %423 = vector.broadcast %cst_145 : f32 to vector<2x1xf32>
    %424 = arith.divf %422, %423 : vector<2x1xf32>
    %425 = vector.broadcast %424 : vector<2x1xf32> to vector<2x32xf32>
    %426 = arith.subf %420, %425 : vector<2x32xf32>
    %427 = arith.mulf %426, %426 : vector<2x32xf32>
    %cst_146 = arith.constant dense<0.000000e+00> : vector<2xf32>
    %428 = vector.multi_reduction <add>, %427, %cst_146 [1] : vector<2x32xf32> to vector<2xf32>
    %429 = vector.shape_cast %428 : vector<2xf32> to vector<2x1xf32>
    %cst_147 = arith.constant 3.200000e+01 : f32
    %430 = vector.broadcast %cst_147 : f32 to vector<2x1xf32>
    %431 = arith.divf %429, %430 : vector<2x1xf32>
    %432 = vector.broadcast %424 : vector<2x1xf32> to vector<2x32xf32>
    %433 = arith.subf %420, %432 : vector<2x32xf32>
    %cst_148 = arith.constant 9.99999974E-6 : f32
    %434 = vector.broadcast %cst_148 : f32 to vector<2x1xf32>
    %435 = arith.addf %431, %434 : vector<2x1xf32>
    %436 = math.rsqrt %435 : vector<2x1xf32>
    %437 = vector.broadcast %436 : vector<2x1xf32> to vector<2x32xf32>
    %438 = arith.mulf %433, %437 : vector<2x32xf32>
    %439 = vector.broadcast %19 : vector<1x32xf32> to vector<2x32xf32>
    %440 = arith.mulf %438, %439 : vector<2x32xf32>
    %441 = vector.broadcast %20 : vector<1x32xf32> to vector<2x32xf32>
    %442 = arith.addf %440, %441 : vector<2x32xf32>
    %cst_149 = arith.constant dense<0.000000e+00> : vector<2x128xf32>
    %443 = tpu.matmul %442, %7, %cst_149 {dimension_numbers = #tpu.dot_dimension_numbers<[1], [0], [0], [1], [0, 0, 1, 1], [], []>} : vector<2x32xf32>, vector<32x128xf32>, vector<2x128xf32> -> vector<2x128xf32>
    %444 = vector.broadcast %22 : vector<1x128xf32> to vector<2x128xf32>
    %445 = arith.addf %443, %444 : vector<2x128xf32>
    %c0_150 = arith.constant 0 : index
    %c0_151 = arith.constant 0 : index
    %446 = vector.load %arg7[%c0_150, %c0_151] : memref<2x128xf32, #tpu.memory_space<vmem>>, vector<2x128xf32>
    tpu.vector_store %arg7[%c0_150, %c0_151], %445 {strides = array<i32>} : memref<2x128xf32, #tpu.memory_space<vmem>>, vector<2x128xf32>,
    return
  }
}

</mosaic_0001>

<bundles_post_ra>
// kernel: tile.9
= control target key start
LH: loop header
LB: loop body
LE: loop exit
PB: predicated region body
PF: predicated region fallthrough
CT: control target
= control target key end

     0   :  { %vm3_vm0 = vcmask 261120   ;;  %s34_s0 = inlined_call_operand.vmem [shape: f32[2,5,32], index: 0, kind: input, shape index: {}]   ;;  %s35_s1 = inlined_call_operand.vmem [shape: f32[10,32], index: 1, kind: output, shape index: {}]  }
   0x1   :  { %v2_v0 = vld [vmem:[%s34_s0] sm:$0x1f]   ;;  %v10_v1 = vld [vmem:[%s34_s0 + $0x8] sm:$0x1f]  }
   0x2   :  { %4 = vst.msk [vmem:[%s35_s1] sm:$0x1f] %vm3_vm0, %v2_v0   ;;  %11 = vst.msk [vmem:[%s35_s1 + $0x5] sm:$0x1f] %vm3_vm0, %v10_v1  }

// kernel: eq.8
= control target key start
LH: loop header
LB: loop body
LE: loop exit
PB: predicated region body
PF: predicated region fallthrough
CT: control target
= control target key end

     0   :  { %vm8_vm0 = vcmask 39936   ;;  %vm14_vm1 = vcmask 80936   ;;  %s42_s0 = inlined_call_operand.vmem [shape: s32[2,5], index: 0, kind: input, shape index: {}]   ;;  %s43_s1 = inlined_call_operand.vmem [shape: s32[10], index: 1, kind: output, shape index: {}]  }
   0x1   :  { %v5_v0 = vld [vmem:[%s42_s0] sm:$0x3]  ;;  %s25_s0 = smov 5  }
   0x2   :  { %6 = vst [vmem:[#allocation1] sm:$0x3] %v5_v0 }
   0x9   :  { %v11_v1 = vld [vmem:[#allocation1 + $0x1] sm:$0x1]   ;;  %v7_v2 = vld [vmem:[#allocation1] sm:$0x1]  }
   0xa   :  { %12 = vrot.lane.b32.xlu0 %v11_v1, %s25_s0  ;;  %9 = vst.msk [vmem:[#allocation0] sm:$0x1] %vm8_vm0, %v7_v2  }
  0x7c   :  { %v13_v3 = vpop.permute.xlu0 %12  }
  0x7d   :  { %15 = vst.msk [vmem:[#allocation0] sm:$0x1] %vm14_vm1, %v13_v3  }
  0x84   :  { %v20_v4 = vld [vmem:[#allocation0] sm:$0x1] }
  0x85   :  { %23 = vst [vmem:[%s43_s1] sm:$0x1] %v20_v4 }

// kernel: mix_vit_forward.1
= control target key start
LH: loop header
LB: loop body
LE: loop exit
PB: predicated region body
PF: predicated region fallthrough
CT: control target
= control target key end

     0   :  { %vm92_vm0 = vcmask 392192   ;;  %s5316_s0 = inlined_call_operand.vmem [shape: f32[32,48], index: 0, kind: input, shape index: {}]   ;;  %s5317_s1 = inlined_call_operand.vmem [shape: f32[10,32], index: 1, kind: input, shape index: {}]   ;;  %s5318_s2 = inlined_call_operand.vmem [shape: f32[10,10], index: 2, kind: input, shape index: {}]   ;;  %s5319_s3 = inlined_call_operand.vmem [shape: f32[304,32], index: 3, kind: input, shape index: {}]   ;;  %s5320_s4 = inlined_call_operand.vmem [shape: f32[64,128], index: 4, kind: input, shape index: {}]   ;;  %s5321_s5 = inlined_call_operand.vmem [shape: f32[13,32], index: 5, kind: input, shape index: {}]   ;;  %s5322_s6 = inlined_call_operand.vmem [shape: f32[2,128], index: 6, kind: input, shape index: {}]   ;;  %s5323_s7 = inlined_call_operand.hbm [shape: f32[2,128], index: 7, kind: output, shape index: {}]  }
   0x1   :  { %v32_v0 = vld [vmem:[%s5319_s3 + $0x28] sm:$0xff]  ;;  %v31_v1 = vld [vmem:[%s5319_s3 + $0x20] sm:$0xff]  ;;  %v30_v2 = vld [vmem:[%s5319_s3 + $0x18] sm:$0xff] }
   0x2   :  { %3979 = vmatprep.subr.mxu1 %v32_v0  ;;  %v88_v3 = vld [vmem:[%s5316_s0] sm:$0xff] }
   0x3   :  { %3980 = vmatpush3.msra.mxu1 %v32_v0  ;;  %3991 = vmatprep.mubr.msk.f32.mxu1 %vm92_vm0, %v88_v3 }
   0x4   :  { %3981 = vmatprep.subr.mxu1 %v31_v1 }
   0x5   :  { %12 = vsyncpa [#allocation3], 0  ;;  %3982 = vmatpush3.msra.mxu1 %v31_v1  ;;  %v29_v4 = vld [vmem:[%s5319_s3 + $0x10] sm:$0xff]  ;;  %v28_v5 = vld [vmem:[%s5319_s3 + $0x8] sm:$0xff]  ;;  %vm206_vm1 = vcmask 1040384   ;;  %vm208_vm2 = vcmask 1044480  }
   0x6   :  { %3983 = vmatprep.subr.mxu1 %v30_v2  ;;  %v27_v6 = vld [vmem:[%s5319_s3] sm:$0xff]  ;;  %v89_v7 = vld [vmem:[%s5316_s0 + $0x8] sm:$0xff]  ;;  %v90_v8 = vld [vmem:[%s5316_s0 + $0x10] sm:$0xff]  ;;  %vm210_vm3 = vcmask 1045504   ;;  %vm220_vm4 = vcmask 261120   ;;  %vm224_vm5 = vcmask 254976  }
   0x7   :  { %3984 = vmatpush3.msra.mxu1 %v30_v2  ;;  %v91_v9 = vld [vmem:[%s5316_s0 + $0x18] sm:$0xff]  ;;  %v3689_v16 = vld [vmem:[%s5321_s5 + $0x1] ss:$0 sm:$0xff]  ;;  %v73_v18 = vld [vmem:[%s5321_s5] sm:$0x1]  ;;  %vm631_vm6 = vcmask 1041408  }
   0x8   :  { %3985 = vmatprep.subr.mxu1 %v29_v4  ;;  %v202_v20 = vrot.slane %v73_v18, 3  ;;  %v214_v26 = vld [vmem:[%s5317_s1] sm:$0xff]  ;;  %v215_v29 = vld [vmem:[%s5317_s1 + $0x8] sm:$0x3]  ;;  %v4586_v48 = vld [vmem:[%s5319_s3 + $0x38] sm:$0xff]  ;;  %vm509_vm7 = vcmask 64512  }
   0x9   :  { %3986 = vmatpush3.msra.mxu1 %v29_v4  ;;  %v4566_v44 = vld [vmem:[%s5319_s3 + $0x48] sm:$0xff]  ;;  %v4576_v46 = vld [vmem:[%s5319_s3 + $0x40] sm:$0xff]  ;;  %v42_v49 = vld [vmem:[%s5319_s3 + $0x78] sm:$0xff]  ;;  %s4458_s11 = smov 120   ;;  %vm605_vm8 = vcmask 74752   ;;  %vm601_vm9 = vcmask 80896  }
   0xa   :  { %3987 = vmatprep.subr.mxu1 %v28_v5  ;;  %v44_v45 = vld [vmem:[%s5319_s3 + $0x88] sm:$0xff]  ;;  %v43_v47 = vld [vmem:[%s5319_s3 + $0x80] sm:$0xff]  ;;  %v4596_v50 = vld [vmem:[%s5319_s3 + $0x30] sm:$0xff]  ;;  %s4459_s18 = smov 112   ;;  %s4460_s19 = smov 104   ;;  %vm4462_vm14 = vmmov 0  }
   0xb   :  { %3988 = vmatpush3.msra.mxu1 %v28_v5  ;;  %4019 = vmatprep.subr.mxu0 %v44_v45  ;;  %v41_v51 = vld [vmem:[%s5319_s3 + $0x70] sm:$0xff]  ;;  %v4606_v52 = vld [vmem:[%s5319_s3 + $0x68] sm:$0xff]  ;;  %v4612_v60 = vld [vmem:[%s5321_s5 + $0x2] ss:$0 sm:$0xff] }
   0xc   :  { %3989 = vmatprep.subr.mxu1 %v27_v6  ;;  %4020 = vmatpush3.msra.mxu0 %v44_v45  ;;  %v4617_v62 = vld [vmem:[%s5321_s5 + $0x3] ss:$0 sm:$0xff] }
   0xd   :  { %3990 = vmatpush3.msra.mxu1 %v27_v6  ;;  %4021 = vmatprep.subr.mxu0 %v43_v47  ;;  %v4628_v5 = vld [vmem:[%s5319_s3 + $0x60] sm:$0xff]  ;;  %v4637_v6 = vld [vmem:[%s5319_s3 + $0x58] sm:$0xff] }
   0xe   :  { %3992 = vmatmul.mubr.msk.f32.vlgmr.msra.gmra.mxu1 %vm92_vm0, %v89_v7  ;;  %3997 = vmatprep.subr.mxu1 %v4566_v44  ;;  %v4644_v7 = vld [vmem:[%s5319_s3 + $0x50] sm:$0xff] }
   0xf   :  { %3994 = vmatprep.mubr.msk.f32.mxu1 %vm92_vm0, %v90_v8  ;;  %3998 = vmatpush3.msra.mxu1 %v4566_v44  ;;  %v3698_v8 = vld [vmem:[%s5321_s5 + $0x6] ss:$0 sm:$0xff] }
  0x10   :  { %3999 = vmatprep.subr.mxu1 %v4576_v46  ;;  %4022 = vmatpush3.msra.mxu0 %v43_v47 }
  0x11   :  { %4000 = vmatpush3.msra.mxu1 %v4576_v46  ;;  %4023 = vmatprep.subr.mxu0 %v42_v49 }
  0x12   :  { %3995 = vmatmul.mubr.msk.f32.gmra.mxu1 %vm92_vm0, %v91_v9  ;;  %4001 = vmatprep.subr.mxu1 %v4586_v48 }
  0x13   :  { %4002 = vmatpush3.msra.mxu1 %v4586_v48  ;;  %4024 = vmatpush3.msra.mxu0 %v42_v49 }
  0x14   :  { %4003 = vmatprep.subr.mxu1 %v4596_v50  ;;  %4025 = vmatprep.subr.mxu0 %v41_v51 }
  0x15   :  { %4004 = vmatpush3.msra.mxu1 %v4596_v50  ;;  %4026 = vmatpush3.msra.mxu0 %v41_v51 }
  0x16   :  { %4008 = vmatprep.subr.mxu1 %v4606_v52 }
  0xce   :  { %v3993_v10 = vpop.f32.mrf.mxu1 }
  0xd0   :  { %v171_v11 = vpop.f32.mrf.mxu1 }
  0xd1   :  { %v190_v14 = vmax.f32 %v171_v11, %v3993_v10 }
  0xd2   :  { %v3996_v12 = vpop.f32.mrf.mxu1 }
  0xd4   :  { %v181_v13 = vpop.f32.mrf.mxu1 }
  0xd5   :  { %v191_v15 = vmax.f32 %v181_v13, %v3996_v12  ;;  %v4659_v12 = vld [vmem:[%s5321_s5 + $0x4] ss:$0 sm:$0xff] }
  0xd7   :  { %v192_v17 = vmax.f32 %v190_v14, %v191_v15 }
  0xd9   :  { %v197_v19 = vadd.f32 %v3689_v16, %v192_v17  ;;  %v4679_v17 = vld [vmem:[%s5321_s5 + $0x5] ss:$0 sm:$0xff] }
  0xdb   :  { %v199_v21 = vrot.slane %v197_v19, 7  ;;  %v204_v22 = vrot.slane %v197_v19, 6 }
  0xdd   :  { %v207_v23 = vsel %vm206_vm1, %v73_v18, %v199_v21  ;;  %v213_v28 = vmul.f32 5.656854, %v204_v22 }
  0xde   :  { %v209_v24 = vsel %vm208_vm2, %v207_v23, %v202_v20 }
  0xdf   :  { %v211_v25 = vsel %vm210_vm3, %v209_v24, %v204_v22  ;;  %v4555_v32 = vadd.f32 %v215_v29, %v213_v28  ;;  %v4706_v28 = vld [vmem:[%s5318_s2 + $0x8] sm:$0x3] }
  0xe0   :  { %v212_v27 = vmul.f32 5.656854, %v211_v25 }
  0xe1   :  { %v225_v33 = vsel %vm224_vm5, %v4555_v32, 0.0 }
  0xe2   :  { %v4551_v30 = vadd.f32 %v214_v26, %v212_v27 }
  0xe4   :  { %v221_v31 = vsel %vm220_vm4, %v4551_v30, 0.0 }
  0xe5   :  { %222 = vadd.xlane.f32.xlu0 %v221_v31 }
  0xe9   :  { %226 = vadd.xlane.f32.xlu0 %v225_v33  ;;  %v4711_v33 = vld [vmem:[%s5318_s2] sm:$0xff] }
 0x16e   :  { %v223_v34 = vpop.xlane.xlu0 %222 }
 0x16f   :  { %v229_v35 = vmul.f32 0.03125, %v223_v34 }
 0x171   :  { %v231_v36 = vsub.f32 %v4551_v30, %v229_v35 }
 0x172   :  { %v227_v37 = vpop.xlane.xlu0 %226 }
 0x173   :  { %v230_v38 = vmul.f32 0.03125, %v227_v37  ;;  %v233_v39 = vmul.f32 %v231_v36, %v231_v36 }
 0x175   :  { %v232_v40 = vsub.f32 %v4555_v32, %v230_v38  ;;  %v235_v41 = vsel %vm220_vm4, %v233_v39, 0.0 }
 0x176   :  { %236 = vadd.xlane.f32.xlu1 %v235_v41 }
 0x177   :  { %v234_v42 = vmul.f32 %v232_v40, %v232_v40 }
 0x179   :  { %v238_v43 = vsel %vm224_vm5, %v234_v42, 0.0 }
 0x17a   :  { %239 = vadd.xlane.f32.xlu1 %v238_v43 }
 0x1ff   :  { %v237_v53 = vpop.xlane.xlu1 %236 }
 0x200   :  { %v241_v54 = vmul.f32 0.03125, %v237_v53 }
 0x202   :  { %v243_v55 = vadd.f32 1e-05, %v241_v54 }
 0x203   :  { %v240_v56 = vpop.xlane.xlu1 %239 }
 0x204   :  { %4324 = vrsqrt.f32 %v243_v55  ;;  %v242_v57 = vmul.f32 0.03125, %v240_v56 }
 0x206   :  { %v244_v58 = vadd.f32 1e-05, %v242_v57 }
 0x208   :  { %4326 = vrsqrt.f32 %v244_v58 }
 0x211   :  { %v4325_v59 = vpop.eup %4324 }
 0x212   :  { %v247_v61 = vmul.f32 %v4325_v59, %v231_v36 }
 0x214   :  { %v253_v63 = vmul.f32 %v4612_v60, %v247_v61 }
 0x215   :  { %v4327_v0 = vpop.eup %4326 }
 0x216   :  { %v248_v1 = vmul.f32 %v4327_v0, %v232_v40  ;;  %v259_v2 = vadd.f32 %v4617_v62, %v253_v63 }
 0x218   :  { %v254_v3 = vmul.f32 %v4612_v60, %v248_v1  ;;  %4005 = vmatprep.mubr.msk.f32.mxu1 %vm220_vm4, %v259_v2  ;;  %4027 = vmatprep.mubr.msk.f32.mxu0 %vm220_vm4, %v259_v2 }
 0x21a   :  { %v260_v4 = vadd.f32 %v4617_v62, %v254_v3 }
 0x21c   :  { %4006 = vmatmul.mubr.msk.f32.vlgmr.msra.gmra.mxu1 %vm220_vm4, %v260_v4  ;;  %4028 = vmatmul.mubr.msk.f32.vlgmr.msra.gmra.mxu0 %vm220_vm4, %v260_v4 }
 0x21d   :  { %4009 = vmatpush3.msra.mxu1 %v4606_v52  ;;  %4016 = vmatprep.mubr.msk.f32.mxu1 %vm220_vm4, %v259_v2 }
 0x21e   :  { %4010 = vmatprep.subr.mxu1 %v4628_v5 }
 0x21f   :  { %4011 = vmatpush3.msra.mxu1 %v4628_v5 }
 0x220   :  { %4012 = vmatprep.subr.mxu1 %v4637_v6 }
 0x221   :  { %4013 = vmatpush3.msra.mxu1 %v4637_v6 }
 0x222   :  { %4014 = vmatprep.subr.mxu1 %v4644_v7 }
 0x223   :  { %4015 = vmatpush3.msra.mxu1 %v4644_v7 }
 0x224   :  { %4017 = vmatmul.mubr.msk.f32.vlgmr.msra.gmra.mxu1 %vm220_vm4, %v260_v4 }
 0x2dc   :  { %v4007_v9 = vpop.f32.mrf.mxu1  ;;  %v4029_v10 = vpop.f32.mrf.mxu0 }
 0x2dd   :  { %v4654_v11 = vadd.f32 %v4029_v10, %v3698_v8  ;;  %v343_v22 = vadd.f32 %v4007_v9, %v4659_v12 }
 0x2de   :  { %v337_v13 = vpop.f32.mrf.mxu1  ;;  %v495_v14 = vpop.f32.mrf.mxu0 }
 0x2df   :  { %v4662_v15 = vadd.f32 %v4659_v12, %v337_v13  ;;  %v4664_v16 = vadd.f32 %v3698_v8, %v495_v14  ;;  %4037 = vmatprep.subr.msk.mxu0 %vm631_vm6, %v4654_v11 }
 0x2e0   :  { %4038 = vmatpush3.msk.msra.mxu0 %vm631_vm6, %v4654_v11 }
 0x2e1   :  { %4039 = vmatprep.subr.mxu0 %v4664_v16  ;;  %793 = vrot.lane.b32.xlu1 %v4662_v15, %s4458_s11 }
 0x2e2   :  { %4034 = vmatprep.mubr.msk.f32.mxu1 %vm509_vm7, %v4662_v15  ;;  %4040 = vmatpush3.msra.mxu0 %v4664_v16 }
 0x2e4   :  { %v4018_v18 = vpop.f32.mrf.mxu1 }
 0x2e5   :  { %v4682_v19 = vadd.f32 %v4018_v18, %v4679_v17 }
 0x2e6   :  { %v416_v20 = vpop.f32.mrf.mxu1 }
 0x2e7   :  { %v417_v21 = vadd.f32 %v4679_v17, %v416_v20  ;;  %799 = vrot.lane.b32.xlu0 %v4682_v19, %s4458_s11  ;;  %4030 = vmatprep.subr.msk.mxu1 %vm509_vm7, %v4682_v19 }
 0x2e8   :  { %4031 = vmatpush3.xpose.msk.msra.mxu1 %vm509_vm7, %v4682_v19 }
 0x2e9   :  { %4032 = vmatprep.subr.msk.mxu1 %vm509_vm7, %v417_v21  ;;  %797 = vrot.lane.b32.xlu1 %v417_v21, %s4458_s11 }
 0x2ec   :  { %4033 = vmatpush3.xpose.msk.msra.mxu1 %vm509_vm7, %v417_v21 }
 0x2ed   :  { %795 = vrot.lane.b32.xlu1 %v343_v22, %s4458_s11 }
 0x2ef   :  { %4035 = vmatmul.mubr.msk.f32.vlgmr.msra.gmra.mxu1 %vm509_vm7, %v343_v22 }
 0x353   :  { %v794_v23 = vpop.permute.xlu1 %793 }
 0x354   :  { %4053 = vmatprep.mubr.msk.f32.mxu1 %vm509_vm7, %v794_v23 }
 0x359   :  { %v800_v24 = vpop.permute.xlu0 %799 }
 0x35a   :  { %4049 = vmatprep.subr.msk.mxu1 %vm509_vm7, %v800_v24 }
 0x35b   :  { %v798_v25 = vpop.permute.xlu1 %797  ;;  %4050 = vmatpush3.xpose.msk.msra.mxu1 %vm509_vm7, %v800_v24 }
 0x35c   :  { %4051 = vmatprep.subr.msk.mxu1 %vm509_vm7, %v798_v25 }
 0x35f   :  { %4052 = vmatpush3.xpose.msk.msra.mxu1 %vm509_vm7, %v798_v25  ;;  %v796_v26 = vpop.permute.xlu1 %795 }
 0x362   :  { %4054 = vmatmul.mubr.msk.f32.vlgmr.msra.gmra.mxu1 %vm509_vm7, %v796_v26 }
 0x3af   :  { %v4036_v27 = vpop.f32.mrf.mxu1 }
 0x3b0   :  { %v598_v29 = vmul.f32 0.35355338, %v4036_v27 }
 0x3b1   :  { %v588_v31 = vpop.f32.mrf.mxu1 }
 0x3b2   :  { %v597_v34 = vmul.f32 0.35355338, %v588_v31  ;;  %v600_v35 = vadd.f32 %v598_v29, %v4706_v28 }
 0x3b4   :  { %v606_v36 = vsel %vm605_vm8, %v600_v35, -inf  ;;  %v599_v37 = vadd.f32 %v597_v34, %v4711_v33 }
 0x3b5   :  { %607 = vmax.xlane.f32.xlu1 %v606_v36 }
 0x3b6   :  { %v602_v38 = vsel %vm601_vm9, %v599_v37, -inf }
 0x3b7   :  { %603 = vmax.xlane.f32.xlu0 %v602_v38 }
 0x3c6   :  { %1086 = vrot.lane.b32.xlu1 %v417_v21, %s4459_s18 }
 0x3ca   :  { %1082 = vrot.lane.b32.xlu1 %v4662_v15, %s4459_s18 }
 0x3ce   :  { %1084 = vrot.lane.b32.xlu1 %v343_v22, %s4459_s18 }
 0x422   :  { %v4055_v39 = vpop.f32.mrf.mxu1 }
 0x423   :  { %v885_v40 = vmul.f32 0.35355338, %v4055_v39 }
 0x424   :  { %v875_v61 = vpop.f32.mrf.mxu1 }
 0x425   :  { %v887_v41 = vadd.f32 %v885_v40, %v4706_v28  ;;  %v884_v63 = vmul.f32 0.35355338, %v875_v61 }
 0x427   :  { %v891_v42 = vsel %vm605_vm8, %v887_v41, -inf  ;;  %v886_v0 = vadd.f32 %v884_v63, %v4711_v33 }
 0x428   :  { %892 = vmax.xlane.f32.xlu1 %v891_v42 }
 0x429   :  { %v888_v1 = vsel %vm601_vm9, %v886_v0, -inf }
 0x439   :  { %911 = vrot.lane.b32.xlu1 %v4664_v16, %s4458_s11 }
 0x43d   :  { %1376 = vrot.lane.b32.xlu1 %v4682_v19, %s4460_s19 }
 0x43e   :  { %v608_v43 = vpop.xlane.xlu1 %607 }
 0x43f   :  { %v610_v45 = vsub.f32 %v600_v35, %v608_v43  ;;  %v4755_v35 = vld [vmem:[%s5319_s3 + $0x90] sm:$0xff] }
 0x440   :  { %v604_v47 = vpop.xlane.xlu0 %603  ;;  %4044 = vmatprep.subr.mxu0 %v4755_v35 }
 0x441   :  { %v609_v49 = vsub.f32 %v599_v37, %v604_v47  ;;  %1374 = vrot.lane.b32.xlu1 %v417_v21, %s4460_s19  ;;  %v613_v53 = vmul.f32 1.442695, %v610_v45 }
 0x442   :  { %v1087_v51 = vpop.permute.xlu1 %1086 }
 0x443   :  { %v611_v54 = vmul.f32 1.442695, %v609_v49 }
 0x445   :  { %4328 = vpow2.f32 %v611_v54  ;;  %1372 = vrot.lane.b32.xlu1 %v343_v22, %s4460_s19 }
 0x446   :  { %v1083_v55 = vpop.permute.xlu1 %1082  ;;  %4330 = vpow2.f32 %v613_v53 }
 0x447   :  { %4072 = vmatprep.mubr.msk.f32.mxu1 %vm509_vm7, %v1083_v55 }
 0x44a   :  { %v1085_v2 = vpop.permute.xlu1 %1084 }
 0x452   :  { %v4329_v56 = vpop.eup %4328 }
 0x453   :  { %v615_v57 = vsel %vm601_vm9, %v4329_v56, 0.0  ;;  %v4331_v58 = vpop.eup %4330 }
 0x454   :  { %616 = vadd.xlane.f32.xlu0 %v615_v57  ;;  %v618_v59 = vsel %vm605_vm8, %v4331_v58, 0.0 }
 0x458   :  { %619 = vadd.xlane.f32.xlu0 %v618_v59  ;;  %v4781_v59 = vld [vmem:[%s5319_s3 + $0x98] sm:$0xff] }
 0x46e   :  { %1088 = vrot.lane.b32.xlu0 %v4682_v19, %s4459_s18 }
 0x48d   :  { %889 = vmax.xlane.f32.xlu0 %v888_v1 }
 0x4b1   :  { %v893_v3 = vpop.xlane.xlu1 %892 }
 0x4b2   :  { %v895_v4 = vsub.f32 %v887_v41, %v893_v3 }
 0x4b4   :  { %v898_v8 = vmul.f32 1.442695, %v895_v4 }
 0x4b5   :  { %v912_v18 = vpop.permute.xlu1 %911 }
 0x4b6   :  { %4332 = vpow2.f32 %v898_v8 }
 0x4b9   :  { %v1377_v20 = vpop.permute.xlu1 %1376 }
 0x4bd   :  { %v1375_v24 = vpop.permute.xlu1 %1374 }
 0x4c1   :  { %v1373_v54 = vpop.permute.xlu1 %1372 }
 0x4c3   :  { %v4736_v9 = vpop.eup %4332 }
 0x4c4   :  { %v903_v10 = vsel %vm605_vm8, %v4736_v9, 0.0 }
 0x4c5   :  { %904 = vadd.xlane.f32.xlu0 %v903_v10 }
 0x4dd   :  { %v617_v13 = vpop.xlane.xlu0 %616 }
 0x4de   :  { %4334 = vrcp.f32 %v617_v13 }
 0x4e1   :  { %v620_v14 = vpop.xlane.xlu0 %619 }
 0x4e2   :  { %4336 = vrcp.f32 %v620_v14 }
 0x4e5   :  { %v1089_v19 = vpop.permute.xlu0 %1088 }
 0x4e6   :  { %4068 = vmatprep.subr.msk.mxu1 %vm509_vm7, %v1089_v19 }
 0x4e7   :  { %4069 = vmatpush3.xpose.msk.msra.mxu1 %vm509_vm7, %v1089_v19 }
 0x4e8   :  { %4070 = vmatprep.subr.msk.mxu1 %vm509_vm7, %v1087_v51 }
 0x4eb   :  { %v4335_v21 = vpop.eup %4334  ;;  %4071 = vmatpush3.xpose.msk.msra.mxu1 %vm509_vm7, %v1087_v51 }
 0x4ec   :  { %4087 = vmatprep.subr.msk.mxu1 %vm509_vm7, %v1377_v20  ;;  %v623_v22 = vmul.f32 %v4335_v21, %v4329_v56 }
 0x4ee   :  { %4041 = vmatprep.mubr.msk.f32.mxu0 %vm601_vm9, %v623_v22  ;;  %4073 = vmatmul.mubr.msk.f32.vlgmr.msra.gmra.mxu1 %vm509_vm7, %v1085_v2 }
 0x4ef   :  { %v4337_v23 = vpop.eup %4336  ;;  %4088 = vmatpush3.xpose.msk.msra.mxu1 %vm509_vm7, %v1377_v20 }
 0x4f0   :  { %4089 = vmatprep.subr.msk.mxu1 %vm509_vm7, %v1375_v24  ;;  %v624_v25 = vmul.f32 %v4337_v23, %v4331_v58 }
 0x4f2   :  { %4042 = vmatmul.mubr.msk.f32.vlgmr.msra.gmra.mxu0 %vm601_vm9, %v624_v25 }
 0x4f3   :  { %4090 = vmatpush3.xpose.msk.msra.mxu1 %vm509_vm7, %v1375_v24  ;;  %4045 = vmatpush3.msra.mxu0 %v4755_v35 }
 0x516   :  { %v890_v26 = vpop.xlane.xlu0 %889 }
 0x517   :  { %v894_v27 = vsub.f32 %v886_v0, %v890_v26 }
 0x519   :  { %v896_v29 = vmul.f32 1.442695, %v894_v27 }
 0x51b   :  { %4338 = vpow2.f32 %v896_v29 }
 0x528   :  { %v4339_v31 = vpop.eup %4338 }
 0x529   :  { %v900_v34 = vsel %vm601_vm9, %v4339_v31, 0.0 }
 0x52a   :  { %901 = vadd.xlane.f32.xlu0 %v900_v34 }
 0x540   :  { %913 = vrot.lane.b32.xlu0 %v4654_v11, %s4458_s11 }
 0x544   :  { %1370 = vrot.lane.b32.xlu0 %v4662_v15, %s4460_s19 }
 0x54e   :  { %v905_v37 = vpop.xlane.xlu0 %904 }
 0x54f   :  { %4340 = vrcp.f32 %v905_v37 }
 0x55c   :  { %v4341_v55 = vpop.eup %4340 }
 0x55d   :  { %v909_v58 = vmul.f32 %v4341_v55, %v4736_v9  ;;  %v4806_v55 = vld [vmem:[%s5319_s3 + $0xa0] sm:$0xff] }
 0x5ae   :  { %v4074_v36 = vpop.f32.mrf.mxu1 }
 0x5af   :  { %v1174_v38 = vmul.f32 0.35355338, %v4074_v36 }
 0x5b0   :  { %v1164_v39 = vpop.f32.mrf.mxu1 }
 0x5b1   :  { %v1173_v40 = vmul.f32 0.35355338, %v1164_v39  ;;  %v1176_v41 = vadd.f32 %v1174_v38, %v4706_v28 }
 0x5b2   :  { %v4043_v42 = vpop.f32.mrf.mxu0 }
 0x5b3   :  { %v902_v43 = vpop.xlane.xlu0 %901  ;;  %v1180_v45 = vsel %vm605_vm8, %v1176_v41, -inf  ;;  %v1175_v47 = vadd.f32 %v1173_v40, %v4711_v33 }
 0x5b4   :  { %4342 = vrcp.f32 %v902_v43  ;;  %v701_v49 = vpop.f32.mrf.mxu0  ;;  %1181 = vmax.xlane.f32.xlu1 %v1180_v45 }
 0x5b5   :  { %4046 = vmatprep.mubr.msk.f32.mxu0 %vm509_vm7, %v701_v49  ;;  %v1177_v15 = vsel %vm601_vm9, %v1175_v47, -inf }
 0x5b6   :  { %4047 = vmatmul.mubr.msk.f32.vlgmr.msra.gmra.mxu0 %vm509_vm7, %v4043_v42  ;;  %1178 = vmax.xlane.f32.xlu0 %v1177_v15 }
 0x5b7   :  { %v914_v51 = vpop.permute.xlu0 %913 }
 0x5b8   :  { %4056 = vmatprep.subr.msk.mxu0 %vm631_vm6, %v914_v51 }
 0x5b9   :  { %4057 = vmatpush3.msk.msra.mxu0 %vm631_vm6, %v914_v51 }
 0x5ba   :  { %4058 = vmatprep.subr.mxu0 %v912_v18 }
 0x5bb   :  { %4059 = vmatpush3.msra.mxu0 %v912_v18  ;;  %v1371_v53 = vpop.permute.xlu0 %1370 }
 0x5bc   :  { %4091 = vmatprep.mubr.msk.f32.mxu1 %vm509_vm7, %v1371_v53  ;;  %4063 = vmatprep.subr.mxu0 %v4781_v59 }
 0x5bd   :  { %4092 = vmatmul.mubr.msk.f32.vlgmr.msra.gmra.mxu1 %vm509_vm7, %v1373_v54 }
 0x5c1   :  { %v4343_v56 = vpop.eup %4342 }
 0x5c2   :  { %v908_v57 = vmul.f32 %v4343_v56, %v4339_v31  ;;  %v4817_v56 = vld [vmem:[%s5321_s5 + $0x7] ss:$0 sm:$0xff] }
 0x5c4   :  { %4060 = vmatprep.mubr.msk.f32.mxu0 %vm601_vm9, %v908_v57 }
 0x5c5   :  { %1199 = vrot.lane.b32.xlu1 %v4664_v16, %s4459_s18  ;;  %4061 = vmatmul.mubr.msk.f32.vlgmr.msra.gmra.mxu0 %vm601_vm9, %v909_v58 }
 0x5c6   :  { %4064 = vmatpush3.msra.mxu0 %v4781_v59 }
 0x63d   :  { %v1182_v61 = vpop.xlane.xlu1 %1181 }
 0x63e   :  { %v1184_v63 = vsub.f32 %v1176_v41, %v1182_v61 }
 0x63f   :  { %v1179_v0 = vpop.xlane.xlu0 %1178 }
 0x640   :  { %v1187_v1 = vmul.f32 1.442695, %v1184_v63  ;;  %v1183_v2 = vsub.f32 %v1175_v47, %v1179_v0 }
 0x641   :  { %v1200_v36 = vpop.permute.xlu1 %1199 }
 0x642   :  { %4344 = vpow2.f32 %v1187_v1  ;;  %v1185_v3 = vmul.f32 1.442695, %v1183_v2 }
 0x644   :  { %4346 = vpow2.f32 %v1185_v3 }
 0x64f   :  { %v4345_v4 = vpop.eup %4344 }
 0x650   :  { %v1192_v8 = vsel %vm605_vm8, %v4345_v4, 0.0 }
 0x651   :  { %v4347_v9 = vpop.eup %4346  ;;  %1193 = vadd.xlane.f32.xlu0 %v1192_v8 }
 0x652   :  { %v1189_v10 = vsel %vm601_vm9, %v4347_v9, 0.0 }
 0x655   :  { %1190 = vadd.xlane.f32.xlu0 %v1189_v10 }
 0x66b   :  { %1201 = vrot.lane.b32.xlu0 %v4654_v11, %s4459_s18 }
 0x676   :  { %v4048_v14 = vpop.f32.mrf.mxu0 }
 0x677   :  { %v792_v57 = vadd.f32 %v4048_v14, %v4817_v56 }
 0x678   :  { %v4790_v22 = vpop.f32.mrf.mxu0 }
 0x679   :  { %v791_v14 = vadd.f32 %v4817_v56, %v4790_v22 }
 0x67d   :  { %v4093_v13 = vpop.f32.mrf.mxu1 }
 0x67e   :  { %v1462_v20 = vmul.f32 0.35355338, %v4093_v13  ;;  %v4829_v13 = vld [vmem:[%s5319_s3 + $0xa8] sm:$0xff] }
 0x67f   :  { %v1452_v18 = vpop.f32.mrf.mxu1 }
 0x680   :  { %v1461_v19 = vmul.f32 0.35355338, %v1452_v18  ;;  %v1464_v25 = vadd.f32 %v1462_v20, %v4706_v28 }
 0x682   :  { %v1463_v21 = vadd.f32 %v1461_v19, %v4711_v33  ;;  %v1468_v27 = vsel %vm605_vm8, %v1464_v25, -inf }
 0x684   :  { %v1465_v23 = vsel %vm601_vm9, %v1463_v21, -inf }
 0x685   :  { %v4062_v24 = vpop.f32.mrf.mxu0  ;;  %1466 = vmax.xlane.f32.xlu1 %v1465_v23 }
 0x687   :  { %v990_v26 = vpop.f32.mrf.mxu0 }
 0x688   :  { %4065 = vmatprep.mubr.msk.f32.mxu0 %vm509_vm7, %v990_v26 }
 0x689   :  { %4066 = vmatmul.mubr.msk.f32.vlgmr.msra.gmra.mxu0 %vm509_vm7, %v4062_v24 }
 0x68a   :  { %1469 = vmax.xlane.f32.xlu0 %v1468_v27 }
 0x6da   :  { %v1194_v29 = vpop.xlane.xlu0 %1193 }
 0x6db   :  { %4348 = vrcp.f32 %v1194_v29 }
 0x6de   :  { %v1191_v31 = vpop.xlane.xlu0 %1190 }
 0x6df   :  { %4350 = vrcp.f32 %v1191_v31 }
 0x6e2   :  { %v1202_v34 = vpop.permute.xlu0 %1201 }
 0x6e3   :  { %4075 = vmatprep.subr.msk.mxu0 %vm631_vm6, %v1202_v34 }
 0x6e4   :  { %4076 = vmatpush3.msk.msra.mxu0 %vm631_vm6, %v1202_v34 }
 0x6e5   :  { %4077 = vmatprep.subr.mxu0 %v1200_v36 }
 0x6e6   :  { %4078 = vmatpush3.msra.mxu0 %v1200_v36 }
 0x6e7   :  { %4082 = vmatprep.subr.mxu0 %v4806_v55 }
 0x6e8   :  { %v4349_v37 = vpop.eup %4348 }
 0x6e9   :  { %v1198_v40 = vmul.f32 %v4349_v37, %v4345_v4 }
 0x6ec   :  { %v4351_v38 = vpop.eup %4350 }
 0x6ed   :  { %v1197_v39 = vmul.f32 %v4351_v38, %v4347_v9 }
 0x6ef   :  { %4079 = vmatprep.mubr.msk.f32.mxu0 %vm601_vm9, %v1197_v39 }
 0x6f0   :  { %4080 = vmatmul.mubr.msk.f32.vlgmr.msra.gmra.mxu0 %vm601_vm9, %v1198_v40 }
 0x6f1   :  { %4083 = vmatpush3.msra.mxu0 %v4806_v55 }
 0x70e   :  { %v1467_v41 = vpop.xlane.xlu1 %1466 }
 0x70f   :  { %v1471_v42 = vsub.f32 %v1463_v21, %v1467_v41 }
 0x711   :  { %v1473_v43 = vmul.f32 1.442695, %v1471_v42 }
 0x713   :  { %4352 = vpow2.f32 %v1473_v43  ;;  %v1470_v45 = vpop.xlane.xlu0 %1469 }
 0x714   :  { %v1472_v47 = vsub.f32 %v1464_v25, %v1470_v45 }
 0x716   :  { %v1475_v49 = vmul.f32 1.442695, %v1472_v47 }
 0x718   :  { %4354 = vpow2.f32 %v1475_v49  ;;  %v4854_v49 = vld [vmem:[%s5320_s4 + $0x18] sm:$0xff] }
 0x719   :  { %4106 = vmatprep.subr.mxu1 %v4854_v49 }
 0x71a   :  { %4107 = vmatpush3.msra.mxu1 %v4854_v49 }
 0x720   :  { %v4353_v15 = vpop.eup %4352 }
 0x721   :  { %v1477_v51 = vsel %vm601_vm9, %v4353_v15, 0.0 }
 0x722   :  { %1478 = vadd.xlane.f32.xlu0 %v1477_v51  ;;  %v4866_v51 = vld [vmem:[%s5320_s4 + $0x8] sm:$0xff] }
 0x725   :  { %v4355_v53 = vpop.eup %4354 }
 0x726   :  { %v1480_v54 = vsel %vm605_vm8, %v4355_v53, 0.0 }
 0x727   :  { %1481 = vadd.xlane.f32.xlu1 %v1480_v54 }
 0x738   :  { %1489 = vrot.lane.b32.xlu0 %v4654_v11, %s4460_s19  ;;  %1487 = vrot.lane.b32.xlu1 %v4664_v16, %s4460_s19 }
 0x749   :  { %v4067_v58 = vpop.f32.mrf.mxu0 }
 0x74a   :  { %v1081_v61 = vadd.f32 %v4067_v58, %v792_v57 }
 0x74b   :  { %v1071_v0 = vpop.f32.mrf.mxu0 }
 0x74c   :  { %v1080_v19 = vadd.f32 %v1071_v0, %v791_v14 }
 0x7ab   :  { %v1479_v63 = vpop.xlane.xlu0 %1478 }
 0x7ac   :  { %4356 = vrcp.f32 %v1479_v63 }
 0x7af   :  { %v1490_v1 = vpop.permute.xlu0 %1489 }
 0x7b0   :  { %v4081_v2 = vpop.f32.mrf.mxu0  ;;  %v1482_v3 = vpop.xlane.xlu1 %1481  ;;  %4094 = vmatprep.subr.msk.mxu0 %vm631_vm6, %v1490_v1 }
 0x7b1   :  { %4358 = vrcp.f32 %v1482_v3  ;;  %v3738_v3 = vld [vmem:[%s5321_s5 + $0x8] ss:$0 sm:$0xff] }
 0x7b2   :  { %v1278_v11 = vpop.f32.mrf.mxu0 }
 0x7b3   :  { %4084 = vmatprep.mubr.msk.f32.mxu0 %vm509_vm7, %v1278_v11 }
 0x7b4   :  { %4085 = vmatmul.mubr.msk.f32.vlgmr.msra.gmra.mxu0 %vm509_vm7, %v4081_v2  ;;  %v1488_v16 = vpop.permute.xlu1 %1487 }
 0x7b5   :  { %4095 = vmatpush3.msk.msra.mxu0 %vm631_vm6, %v1490_v1 }
 0x7b6   :  { %4096 = vmatprep.subr.mxu0 %v1488_v16 }
 0x7b7   :  { %4097 = vmatpush3.msra.mxu0 %v1488_v16 }
 0x7b8   :  { %4101 = vmatprep.subr.mxu0 %v4829_v13 }
 0x7b9   :  { %v4357_v4 = vpop.eup %4356 }
 0x7ba   :  { %v1485_v8 = vmul.f32 %v4357_v4, %v4353_v15  ;;  %v4859_v15 = vld [vmem:[%s5320_s4 + $0x10] sm:$0xff] }
 0x7bb   :  { %4108 = vmatprep.subr.mxu1 %v4859_v15 }
 0x7bc   :  { %4098 = vmatprep.mubr.msk.f32.mxu0 %vm601_vm9, %v1485_v8  ;;  %4109 = vmatpush3.msra.mxu1 %v4859_v15  ;;  %v3739_v8 = vld [vmem:[%s5321_s5 + $0x9] ss:$0 sm:$0xff] }
 0x7bd   :  { %4110 = vmatprep.subr.mxu1 %v4866_v51 }
 0x7be   :  { %v4359_v9 = vpop.eup %4358  ;;  %4111 = vmatpush3.msra.mxu1 %v4866_v51 }
 0x7bf   :  { %v1486_v10 = vmul.f32 %v4359_v9, %v4355_v53  ;;  %v4873_v53 = vld [vmem:[%s5320_s4] sm:$0xff] }
 0x7c0   :  { %4112 = vmatprep.subr.mxu1 %v4873_v53 }
 0x7c1   :  { %4099 = vmatmul.mubr.msk.f32.vlgmr.msra.gmra.mxu0 %vm601_vm9, %v1486_v10  ;;  %4113 = vmatpush3.msra.mxu1 %v4873_v53 }
 0x7c2   :  { %4102 = vmatpush3.msra.mxu0 %v4829_v13  ;;  %4152 = vmatprep.subr.mxu1 %v4566_v44 }
 0x874   :  { %v4086_v18 = vpop.f32.mrf.mxu0 }
 0x875   :  { %v1369_v20 = vadd.f32 %v4086_v18, %v1081_v61  ;;  %v4899_v18 = vld [vmem:[%s5319_s3 + $0x128] sm:$0xff] }
 0x876   :  { %v1359_v21 = vpop.f32.mrf.mxu0  ;;  %4117 = vmatprep.subr.mxu0 %v4899_v18 }
 0x877   :  { %v1368_v23 = vadd.f32 %v1359_v21, %v1080_v19  ;;  %v4941_v19 = vld [vmem:[%s5319_s3 + $0xf8] sm:$0xff]  ;;  %v4955_v21 = vld [vmem:[%s5319_s3 + $0xe8] sm:$0xff] }
 0x881   :  { %v4100_v24 = vpop.f32.mrf.mxu0 }
 0x883   :  { %v1566_v25 = vpop.f32.mrf.mxu0 }
 0x884   :  { %4103 = vmatprep.mubr.msk.f32.mxu0 %vm509_vm7, %v1566_v25  ;;  %v4976_v25 = vld [vmem:[%s5319_s3 + $0xd0] sm:$0xff] }
 0x885   :  { %4104 = vmatmul.mubr.msk.f32.vlgmr.msra.gmra.mxu0 %vm509_vm7, %v4100_v24  ;;  %v4969_v24 = vld [vmem:[%s5319_s3 + $0xd8] sm:$0xff] }
 0x886   :  { %4118 = vmatpush3.msra.mxu0 %v4899_v18 }
 0x945   :  { %v4105_v26 = vpop.f32.mrf.mxu0 }
 0x946   :  { %v1657_v27 = vadd.f32 %v4105_v26, %v1369_v20  ;;  %v4948_v20 = vld [vmem:[%s5319_s3 + $0xf0] sm:$0xff]  ;;  %v4983_v26 = vld [vmem:[%s5319_s3 + $0xc8] sm:$0xff] }
 0x947   :  { %v1647_v29 = vpop.f32.mrf.mxu0 }
 0x948   :  { %v4838_v31 = vadd.f32 %v1657_v27, %v4555_v32  ;;  %v1656_v34 = vadd.f32 %v1647_v29, %v1368_v23  ;;  %v4962_v23 = vld [vmem:[%s5319_s3 + $0xe0] sm:$0xff]  ;;  %v4996_v29 = vld [vmem:[%s5319_s3 + $0xb8] sm:$0xff] }
 0x949   :  { %v4990_v27 = vld [vmem:[%s5319_s3 + $0xc0] sm:$0xff] }
 0x94a   :  { %v4841_v22 = vadd.f32 %v1656_v34, %v4551_v30  ;;  %v1663_v36 = vsel %vm224_vm5, %v4838_v31, 0.0  ;;  %v5002_v34 = vld [vmem:[%s5319_s3 + $0xb0] sm:$0xff] }
 0x94b   :  { %1664 = vadd.xlane.f32.xlu0 %v1663_v36  ;;  %v5011_v36 = vld [vmem:[%s5322_s6] ss:$0 sm:$0xff] }
 0x94c   :  { %v1660_v37 = vsel %vm220_vm4, %v4841_v22, 0.0  ;;  %5326 = vst [vmem:[#allocation5_spill] sm:$0xff] %v5011_v36 }
 0x94d   :  { %1661 = vadd.xlane.f32.xlu1 %v1660_v37 }
 0x9d4   :  { %v1665_v38 = vpop.xlane.xlu0 %1664 }
 0x9d5   :  { %v1667_v39 = vmul.f32 0.03125, %v1665_v38 }
 0x9d6   :  { %v1662_v40 = vpop.xlane.xlu1 %1661 }
 0x9d7   :  { %v1669_v41 = vsub.f32 %v4838_v31, %v1667_v39  ;;  %v1666_v42 = vmul.f32 0.03125, %v1662_v40 }
 0x9d9   :  { %v1668_v32 = vsub.f32 %v4841_v22, %v1666_v42  ;;  %v1671_v43 = vmul.f32 %v1669_v41, %v1669_v41 }
 0x9db   :  { %v1675_v30 = vsel %vm224_vm5, %v1671_v43, 0.0  ;;  %v1670_v45 = vmul.f32 %v1668_v32, %v1668_v32 }
 0x9dc   :  { %1676 = vadd.xlane.f32.xlu1 %v1675_v30 }
 0x9dd   :  { %v1672_v47 = vsel %vm220_vm4, %v1670_v45, 0.0 }
 0x9de   :  { %1673 = vadd.xlane.f32.xlu0 %v1672_v47 }
 0xa65   :  { %v1677_v54 = vpop.xlane.xlu1 %1676 }
 0xa66   :  { %v1679_v57 = vmul.f32 0.03125, %v1677_v54 }
 0xa67   :  { %v1674_v58 = vpop.xlane.xlu0 %1673 }
 0xa68   :  { %v1681_v61 = vadd.f32 1e-05, %v1679_v57  ;;  %v1678_v63 = vmul.f32 0.03125, %v1674_v58 }
 0xa6a   :  { %4360 = vrsqrt.f32 %v1681_v61  ;;  %v1680_v0 = vadd.f32 1e-05, %v1678_v63 }
 0xa6c   :  { %4362 = vrsqrt.f32 %v1680_v0 }
 0xa77   :  { %v4361_v1 = vpop.eup %4360 }
 0xa78   :  { %v1685_v2 = vmul.f32 %v4361_v1, %v1669_v41 }
 0xa79   :  { %v4363_v11 = vpop.eup %4362 }
 0xa7a   :  { %v1684_v16 = vmul.f32 %v4363_v11, %v1668_v32  ;;  %v1691_v4 = vmul.f32 %v3738_v3, %v1685_v2 }
 0xa7c   :  { %v1690_v9 = vmul.f32 %v3738_v3, %v1684_v16  ;;  %v1697_v14 = vadd.f32 %v3739_v8, %v1691_v4 }
 0xa7e   :  { %v1696_v10 = vadd.f32 %v3739_v8, %v1690_v9 }
 0xa80   :  { %4114 = vmatprep.mubr.msk.f32.mxu1 %vm220_vm4, %v1696_v10 }
 0xa81   :  { %4115 = vmatmul.mubr.msk.f32.vlgmr.msra.gmra.mxu1 %vm220_vm4, %v1697_v14 }
 0xa82   :  { %4153 = vmatpush3.msra.mxu1 %v4566_v44  ;;  %v4906_v44 = vld [vmem:[%s5319_s3 + $0x120] sm:$0xff] }
 0xa83   :  { %4154 = vmatprep.subr.mxu1 %v4576_v46  ;;  %4119 = vmatprep.subr.mxu0 %v4906_v44 }
 0xa84   :  { %4155 = vmatpush3.msra.mxu1 %v4576_v46  ;;  %4120 = vmatpush3.msra.mxu0 %v4906_v44  ;;  %v4913_v46 = vld [vmem:[%s5319_s3 + $0x118] sm:$0xff] }
 0xa85   :  { %4156 = vmatprep.subr.mxu1 %v4586_v48  ;;  %4121 = vmatprep.subr.mxu0 %v4913_v46 }
 0xa86   :  { %4157 = vmatpush3.msra.mxu1 %v4586_v48  ;;  %4122 = vmatpush3.msra.mxu0 %v4913_v46  ;;  %v4920_v48 = vld [vmem:[%s5319_s3 + $0x110] sm:$0xff] }
 0xa87   :  { %4158 = vmatprep.subr.mxu1 %v4596_v50  ;;  %4123 = vmatprep.subr.mxu0 %v4920_v48 }
 0xa88   :  { %4159 = vmatpush3.msra.mxu1 %v4596_v50  ;;  %4124 = vmatpush3.msra.mxu0 %v4920_v48  ;;  %v4927_v50 = vld [vmem:[%s5319_s3 + $0x108] sm:$0xff] }
 0xa89   :  { %4163 = vmatprep.subr.mxu1 %v4606_v52  ;;  %4125 = vmatprep.subr.mxu0 %v4927_v50  ;;  %v4934_v52 = vld [vmem:[%s5319_s3 + $0x100] sm:$0xff] }
 0xa8a   :  { %4126 = vmatpush3.msra.mxu0 %v4927_v50 }
 0xa8b   :  { %4127 = vmatprep.subr.mxu0 %v4934_v52 }
 0xa8c   :  { %4128 = vmatpush3.msra.mxu0 %v4934_v52 }
 0xa8d   :  { %4129 = vmatprep.subr.mxu0 %v4941_v19 }
 0xa8e   :  { %4130 = vmatpush3.msra.mxu0 %v4941_v19 }
 0xa8f   :  { %4131 = vmatprep.subr.mxu0 %v4948_v20 }
 0xa90   :  { %4132 = vmatpush3.msra.mxu0 %v4948_v20 }
 0xa91   :  { %4133 = vmatprep.subr.mxu0 %v4955_v21 }
 0xa92   :  { %4134 = vmatpush3.msra.mxu0 %v4955_v21 }
 0xa93   :  { %4135 = vmatprep.subr.mxu0 %v4962_v23 }
 0xa94   :  { %4136 = vmatpush3.msra.mxu0 %v4962_v23 }
 0xa95   :  { %4137 = vmatprep.subr.mxu0 %v4969_v24 }
 0xa96   :  { %4138 = vmatpush3.msra.mxu0 %v4969_v24 }
 0xa97   :  { %4139 = vmatprep.subr.mxu0 %v4976_v25 }
 0xa98   :  { %4140 = vmatpush3.msra.mxu0 %v4976_v25 }
 0xa99   :  { %4141 = vmatprep.subr.mxu0 %v4983_v26 }
 0xa9a   :  { %4142 = vmatpush3.msra.mxu0 %v4983_v26 }
 0xa9b   :  { %4143 = vmatprep.subr.mxu0 %v4990_v27 }
 0xa9c   :  { %4144 = vmatpush3.msra.mxu0 %v4990_v27 }
 0xa9d   :  { %4145 = vmatprep.subr.mxu0 %v4996_v29 }
 0xa9e   :  { %4146 = vmatpush3.msra.mxu0 %v4996_v29 }
 0xa9f   :  { %4147 = vmatprep.subr.mxu0 %v5002_v34 }
 0xaa0   :  { %4148 = vmatpush3.msra.mxu0 %v5002_v34 }
 0xb41   :  { %v4116_v37 = vpop.f32.mrf.mxu1 }
 0xb42   :  { %v1780_v38 = vadd.f32 %v4116_v37, %v5011_v36 }
 0xb43   :  { %v1774_v39 = vpop.f32.mrf.mxu1 }
 0xb44   :  { %v1786_v40 = vmul.f32 0.70710677, %v1780_v38  ;;  %v1775_v41 = vadd.f32 %v5011_v36, %v1774_v39 }
 0xb46   :  { %v1788_v42 = vand.u32 2147483647, %v1786_v40  ;;  %v1785_v32 = vmul.f32 0.70710677, %v1775_v41  ;;  %vm1828_vm10 = vcmp.ge.f32.partialorder %v1786_v40, 0.0 }
 0xb48   :  { %v1790_v43 = vmul.f32 0.3275911, %v1788_v42  ;;  %v1787_v30 = vand.u32 2147483647, %v1785_v32  ;;  %v1816_v57 = vsub.f32 0.0, %v1788_v42  ;;  %vm1827_vm11 = vcmp.ge.f32.partialorder %v1785_v32, 0.0 }
 0xb4a   :  { %v1792_v45 = vadd.f32 1.0, %v1790_v43  ;;  %v1789_v47 = vmul.f32 0.3275911, %v1787_v30  ;;  %v1815_v58 = vsub.f32 0.0, %v1787_v30  ;;  %v1818_v61 = vmul.f32 %v1816_v57, %v1788_v42 }
 0xb4c   :  { %4364 = vrcp.f32 %v1792_v45  ;;  %v1791_v54 = vadd.f32 1.0, %v1789_v47  ;;  %v1817_v0 = vmul.f32 %v1815_v58, %v1787_v30  ;;  %v1821_v2 = vmul.f32 1.442695, %v1818_v61 }
 0xb4e   :  { %4366 = vrcp.f32 %v1791_v54  ;;  %v1819_v16 = vmul.f32 1.442695, %v1817_v0 }
 0xb4f   :  { %4368 = vpow2.f32 %v1821_v2 }
 0xb50   :  { %4370 = vpow2.f32 %v1819_v16 }
 0xb59   :  { %v4365_v63 = vpop.eup %4364 }
 0xb5a   :  { %v1798_v1 = vmul.f32 1.0614054, %v4365_v63 }
 0xb5b   :  { %v4367_v3 = vpop.eup %4366 }
 0xb5c   :  { %v1800_v11 = vadd.f32 -1.4531521, %v1798_v1  ;;  %v1797_v4 = vmul.f32 1.0614054, %v4367_v3  ;;  %v4369_v58 = vpop.eup %4368 }
 0xb5d   :  { %v4371_v36 = vpop.eup %4370 }
 0xb5e   :  { %v1802_v8 = vmul.f32 %v4365_v63, %v1800_v11  ;;  %v1799_v9 = vadd.f32 -1.4531521, %v1797_v4 }
 0xb60   :  { %v1804_v10 = vadd.f32 1.4214138, %v1802_v8  ;;  %v1801_v14 = vmul.f32 %v4367_v3, %v1799_v9 }
 0xb62   :  { %v1806_v37 = vmul.f32 %v4365_v63, %v1804_v10  ;;  %v1803_v39 = vadd.f32 1.4214138, %v1801_v14 }
 0xb64   :  { %v1808_v43 = vadd.f32 -0.28449672, %v1806_v37  ;;  %v1805_v45 = vmul.f32 %v4367_v3, %v1803_v39  ;;  %v1783_v37 = vmul.f32 0.5, %v1775_v41 }
 0xb66   :  { %v1810_v47 = vmul.f32 %v4365_v63, %v1808_v43  ;;  %v1807_v42 = vadd.f32 -0.28449672, %v1805_v45  ;;  %v1784_v43 = vmul.f32 0.5, %v1780_v38 }
 0xb68   :  { %v1812_v54 = vadd.f32 0.2548296, %v1810_v47  ;;  %v1809_v30 = vmul.f32 %v4367_v3, %v1807_v42 }
 0xb6a   :  { %v1814_v57 = vmul.f32 %v4365_v63, %v1812_v54  ;;  %v1811_v61 = vadd.f32 0.2548296, %v1809_v30 }
 0xb6c   :  { %v1824_v1 = vmul.f32 %v4369_v58, %v1814_v57  ;;  %v1813_v0 = vmul.f32 %v4367_v3, %v1811_v61  ;;  %v5018_v3 = vld [vmem:[%s5321_s5 + $0xa] ss:$0 sm:$0xff] }
 0xb6e   :  { %v1826_v11 = vsub.f32 1.0, %v1824_v1  ;;  %v1823_v2 = vmul.f32 %v4371_v36, %v1813_v0 }
 0xb70   :  { %v1830_v4 = vsub.f32 0.0, %v1826_v11  ;;  %v1825_v16 = vsub.f32 1.0, %v1823_v2 }
 0xb72   :  { %v1832_v8 = vsel %vm1828_vm10, %v1826_v11, %v1830_v4  ;;  %v1829_v9 = vsub.f32 0.0, %v1825_v16 }
 0xb73   :  { %v1834_v10 = vadd.f32 1.0, %v1832_v8 }
 0xb74   :  { %v1831_v14 = vsel %vm1827_vm11, %v1825_v16, %v1829_v9 }
 0xb75   :  { %v1833_v39 = vadd.f32 1.0, %v1831_v14  ;;  %v1836_v63 = vmul.f32 %v1834_v10, %v1784_v43 }
 0xb77   :  { %v1835_v45 = vmul.f32 %v1833_v39, %v1783_v37 }
 0xb79   :  { %4149 = vmatprep.mubr.f32.mxu0 %v1835_v45 }
 0xb7a   :  { %4150 = vmatmul.mubr.f32.vlgmr.msra.gmra.mxu0 %v1836_v63 }
 0xc3a   :  { %v4151_v36 = vpop.f32.mrf.mxu0 }
 0xc3b   :  { %v1913_v40 = vadd.f32 %v4151_v36, %v5018_v3  ;;  %v4422_v36 = vld [vmem:[%s5321_s5 + $0x2] ss:$0 sm:$0xff] }
 0xc3c   :  { %v1907_v47 = vpop.f32.mrf.mxu0 }
 0xc3d   :  { %v5022_v32 = vadd.f32 %v1913_v40, %v4838_v31  ;;  %v1908_v41 = vadd.f32 %v5018_v3, %v1907_v47 }
 0xc3f   :  { %v5026_v38 = vadd.f32 %v1908_v41, %v4841_v22  ;;  %v1921_v42 = vsel %vm224_vm5, %v5022_v32, 0.0  ;;  %v4423_v41 = vld [vmem:[%s5321_s5 + $0x3] ss:$0 sm:$0xff] }
 0xc40   :  { %1922 = vadd.xlane.f32.xlu1 %v1921_v42 }
 0xc41   :  { %v1918_v54 = vsel %vm220_vm4, %v5026_v38, 0.0 }
 0xc42   :  { %1919 = vadd.xlane.f32.xlu0 %v1918_v54 }
 0xcc9   :  { %v1923_v30 = vpop.xlane.xlu1 %1922 }
 0xcca   :  { %v1925_v57 = vmul.f32 0.03125, %v1923_v30 }
 0xccb   :  { %v1920_v58 = vpop.xlane.xlu0 %1919 }
 0xccc   :  { %v1927_v61 = vsub.f32 %v5022_v32, %v1925_v57  ;;  %v1924_v31 = vmul.f32 0.03125, %v1920_v58 }
 0xcce   :  { %v1926_v1 = vsub.f32 %v5026_v38, %v1924_v31  ;;  %v1929_v0 = vmul.f32 %v1927_v61, %v1927_v61 }
 0xcd0   :  { %v1933_v22 = vsel %vm224_vm5, %v1929_v0, 0.0  ;;  %v1928_v11 = vmul.f32 %v1926_v1, %v1926_v1 }
 0xcd1   :  { %1934 = vadd.xlane.f32.xlu1 %v1933_v22 }
 0xcd2   :  { %v1930_v2 = vsel %vm220_vm4, %v1928_v11, 0.0 }
 0xcd3   :  { %1931 = vadd.xlane.f32.xlu0 %v1930_v2 }
 0xd5a   :  { %v1935_v4 = vpop.xlane.xlu1 %1934 }
 0xd5b   :  { %v1937_v16 = vmul.f32 0.03125, %v1935_v4 }
 0xd5c   :  { %v1932_v8 = vpop.xlane.xlu0 %1931 }
 0xd5d   :  { %v1939_v9 = vadd.f32 1e-05, %v1937_v16  ;;  %v1936_v10 = vmul.f32 0.03125, %v1932_v8 }
 0xd5f   :  { %4372 = vrsqrt.f32 %v1939_v9  ;;  %v1938_v14 = vadd.f32 1e-05, %v1936_v10 }
 0xd61   :  { %4374 = vrsqrt.f32 %v1938_v14 }
 0xd6c   :  { %v4373_v37 = vpop.eup %4372 }
 0xd6d   :  { %v1943_v39 = vmul.f32 %v4373_v37, %v1927_v61 }
 0xd6e   :  { %v4375_v43 = vpop.eup %4374 }
 0xd6f   :  { %v1942_v45 = vmul.f32 %v4375_v43, %v1926_v1  ;;  %v1945_v63 = vmul.f32 %v4612_v60, %v1943_v39  ;;  %v4424_v60 = vld [vmem:[%s5319_s3 + $0x68] sm:$0xff] }
 0xd71   :  { %v1944_v40 = vmul.f32 %v4422_v36, %v1942_v45  ;;  %v1947_v42 = vadd.f32 %v4423_v41, %v1945_v63 }
 0xd73   :  { %v1946_v47 = vadd.f32 %v4617_v62, %v1944_v40  ;;  %v4425_v62 = vld [vmem:[%s5319_s3 + $0x88] sm:$0xff] }
 0xd75   :  { %4160 = vmatprep.mubr.msk.f32.mxu1 %vm220_vm4, %v1946_v47 }
 0xd76   :  { %4161 = vmatmul.mubr.msk.f32.vlgmr.msra.gmra.mxu1 %vm220_vm4, %v1947_v42 }
 0xd77   :  { %4164 = vmatpush3.msra.mxu1 %v4424_v60  ;;  %4171 = vmatprep.mubr.msk.f32.mxu1 %vm220_vm4, %v1946_v47 }
 0xd78   :  { %4165 = vmatprep.subr.mxu1 %v4628_v5 }
 0xd79   :  { %4166 = vmatpush3.msra.mxu1 %v4628_v5  ;;  %v4426_v5 = vld [vmem:[%s5319_s3 + $0x80] sm:$0xff] }
 0xd7a   :  { %4167 = vmatprep.subr.mxu1 %v4637_v6 }
 0xd7b   :  { %4168 = vmatpush3.msra.mxu1 %v4637_v6  ;;  %v4427_v6 = vld [vmem:[%s5319_s3 + $0x78] sm:$0xff] }
 0xd7c   :  { %4169 = vmatprep.subr.mxu1 %v4644_v7 }
 0xd7d   :  { %4170 = vmatpush3.msra.mxu1 %v4644_v7  ;;  %v4428_v7 = vld [vmem:[%s5319_s3 + $0x70] sm:$0xff]  ;;  %s4463_s3 = smov [#allocation2]  }
 0xd7e   :  { %4172 = vmatmul.mubr.msk.f32.vlgmr.msra.gmra.mxu1 %vm220_vm4, %v1947_v42  ;;  %4174 = vmatprep.subr.mxu1 %v4425_v62  ;;  %s3677_s25 = sshll.u32 %s4463_s3, 4  ;;  %s3678_s25 = int_to_ptr.vmem [resolvable:$true] %s3677_s25 }
 0xd7f   :  { %4175 = vmatpush3.msra.mxu1 %v4425_v62  ;;  %4182 = vmatprep.mubr.msk.f32.mxu1 %vm220_vm4, %v1946_v47  ;;  %s4436_s26 = scalar_lea.vmem %s3678_s25, 32  ;;  %p4441_p1 = scmp.lt.s32.totalorder %s3678_s25, %s3678_s25 }
 0xd80   :  { %4176 = vmatprep.subr.mxu1 %v4426_v5  ;;  %p4437_p0 = scmp.ne.s32.totalorder %s3678_s25, %s4436_s26  ;;  %p4442_p2 = scmp.lt.s32.totalorder %s4436_s26, %s4436_s26 }
 0xd81   :  { %4177 = vmatpush3.msra.mxu1 %v4426_v5 }
 0xd82   :  { %4178 = vmatprep.subr.mxu1 %v4427_v6  ;;  %p4443_p3 = por %p4442_p2, %p4441_p1 }
 0xd83   :  { %4179 = vmatpush3.msra.mxu1 %v4427_v6 }
 0xd84   :  { %4180 = vmatprep.subr.mxu1 %v4428_v7  ;;  %p4444_p4 = pnand %p4443_p3, %p4437_p0 }
 0xd85   :  { %4181 = vmatpush3.msra.mxu1 %v4428_v7 }
 0xd86   :  { %4183 = vmatmul.mubr.msk.f32.vlgmr.msra.gmra.mxu1 %vm220_vm4, %v1947_v42 }
 0xe36   :  { %v4162_v54 = vpop.f32.mrf.mxu1 }
 0xe38   :  { %v2020_v30 = vpop.f32.mrf.mxu1 }
 0xe39   :  { %v5072_v57 = vadd.f32 %v4659_v12, %v2020_v30  ;;  %v4429_v12 = vld [vmem:[%s5321_s5 + $0x4] ss:$0 sm:$0xff] }
 0xe3a   :  { %v2026_v0 = vadd.f32 %v4429_v12, %v4162_v54 }
 0xe3b   :  { %2459 = vrot.lane.b32.xlu1 %v5072_v57, %s4458_s11  ;;  %4189 = vmatprep.mubr.msk.f32.mxu1 %vm509_vm7, %v5072_v57 }
 0xe3e   :  { %v4173_v58 = vpop.f32.mrf.mxu1 }
 0xe3f   :  { %v5079_v61 = vadd.f32 %v4173_v58, %v4679_v17 }
 0xe40   :  { %v2095_v31 = vpop.f32.mrf.mxu1 }
 0xe41   :  { %v2096_v1 = vadd.f32 %v4679_v17, %v2095_v31  ;;  %2465 = vrot.lane.b32.xlu0 %v5079_v61, %s4458_s11  ;;  %4185 = vmatprep.subr.msk.mxu1 %vm509_vm7, %v5079_v61  ;;  %v4430_v17 = vld [vmem:[%s5321_s5 + $0x6] ss:$0 sm:$0xff] }
 0xe42   :  { %4186 = vmatpush3.xpose.msk.msra.mxu1 %vm509_vm7, %v5079_v61 }
 0xe43   :  { %4187 = vmatprep.subr.msk.mxu1 %vm509_vm7, %v2096_v1  ;;  %2463 = vrot.lane.b32.xlu1 %v2096_v1, %s4458_s11 }
 0xe46   :  { %v4184_v22 = vpop.f32.mrf.mxu1  ;;  %4188 = vmatpush3.xpose.msk.msra.mxu1 %vm509_vm7, %v2096_v1 }
 0xe47   :  { %v5097_v11 = vadd.f32 %v4430_v17, %v4184_v22  ;;  %2461 = vrot.lane.b32.xlu1 %v2026_v0, %s4458_s11 }
 0xe48   :  { %v2170_v2 = vpop.f32.mrf.mxu1 }
 0xe49   :  { %v5100_v4 = vadd.f32 %v4430_v17, %v2170_v2  ;;  %4190 = vmatmul.mubr.msk.f32.vlgmr.msra.gmra.mxu1 %vm509_vm7, %v2026_v0  ;;  %4192 = vmatprep.subr.msk.mxu0 %vm631_vm6, %v5097_v11 }
 0xe4a   :  { %4193 = vmatpush3.msk.msra.mxu0 %vm631_vm6, %v5097_v11 }
 0xe4b   :  { %4194 = vmatprep.subr.mxu0 %v5100_v4 }
 0xe4c   :  { %4195 = vmatpush3.msra.mxu0 %v5100_v4 }
 0xe4d   :  { %4199 = vmatprep.subr.mxu0 %v4755_v35 }
 0xead   :  { %v2460_v16 = vpop.permute.xlu1 %2459 }
 0xeae   :  { %4208 = vmatprep.mubr.msk.f32.mxu1 %vm509_vm7, %v2460_v16 }
 0xeb3   :  { %v2466_v8 = vpop.permute.xlu0 %2465 }
 0xeb4   :  { %4204 = vmatprep.subr.msk.mxu1 %vm509_vm7, %v2466_v8 }
 0xeb5   :  { %v2464_v9 = vpop.permute.xlu1 %2463  ;;  %4205 = vmatpush3.xpose.msk.msra.mxu1 %vm509_vm7, %v2466_v8 }
 0xeb6   :  { %4206 = vmatprep.subr.msk.mxu1 %vm509_vm7, %v2464_v9 }
 0xeb9   :  { %4207 = vmatpush3.xpose.msk.msra.mxu1 %vm509_vm7, %v2464_v9  ;;  %v2462_v10 = vpop.permute.xlu1 %2461 }
 0xebc   :  { %4209 = vmatmul.mubr.msk.f32.vlgmr.msra.gmra.mxu1 %vm509_vm7, %v2462_v10 }
 0xf09   :  { %v4191_v14 = vpop.f32.mrf.mxu1 }
 0xf0a   :  { %v2267_v37 = vmul.f32 0.35355338, %v4191_v14 }
 0xf0b   :  { %v2257_v39 = vpop.f32.mrf.mxu1 }
 0xf0c   :  { %v2266_v43 = vmul.f32 0.35355338, %v2257_v39  ;;  %v2269_v45 = vadd.f32 %v2267_v37, %v4706_v28  ;;  %v5127_v28 = vld [vmem:[%s5318_s2 + $0x8] sm:$0x3] }
 0xf0e   :  { %v2273_v63 = vsel %vm605_vm8, %v2269_v45, -inf  ;;  %v2268_v36 = vadd.f32 %v2266_v43, %v4711_v33 }
 0xf0f   :  { %2274 = vmax.xlane.f32.xlu1 %v2273_v63 }
 0xf10   :  { %v2270_v40 = vsel %vm601_vm9, %v2268_v36, -inf }
 0xf11   :  { %2271 = vmax.xlane.f32.xlu0 %v2270_v40 }
 0xf20   :  { %2752 = vrot.lane.b32.xlu1 %v2096_v1, %s4459_s18 }
 0xf24   :  { %2748 = vrot.lane.b32.xlu1 %v5072_v57, %s4459_s18 }
 0xf28   :  { %2750 = vrot.lane.b32.xlu1 %v2026_v0, %s4459_s18 }
 0xf7c   :  { %v4210_v47 = vpop.f32.mrf.mxu1 }
 0xf7d   :  { %v2551_v41 = vmul.f32 0.35355338, %v4210_v47 }
 0xf7f   :  { %v2553_v33 = vadd.f32 %v5127_v28, %v2551_v41 }
 0xf81   :  { %v2557_v42 = vsel %vm605_vm8, %v2553_v33, -inf }
 0xf82   :  { %2558 = vmax.xlane.f32.xlu1 %v2557_v42 }
 0xf93   :  { %2577 = vrot.lane.b32.xlu1 %v5100_v4, %s4458_s11 }
 0xf97   :  { %3042 = vrot.lane.b32.xlu1 %v5079_v61, %s4460_s19 }
 0xf98   :  { %v2275_v60 = vpop.xlane.xlu1 %2274 }
 0xf99   :  { %v2277_v62 = vsub.f32 %v2269_v45, %v2275_v60 }
 0xf9a   :  { %v2272_v5 = vpop.xlane.xlu0 %2271 }
 0xf9b   :  { %v2276_v6 = vsub.f32 %v2268_v36, %v2272_v5  ;;  %3040 = vrot.lane.b32.xlu1 %v2096_v1, %s4460_s19  ;;  %v2280_v54 = vmul.f32 1.442695, %v2277_v62  ;;  %v2541_v1 = vpop.f32.mrf.mxu1 }
 0xf9c   :  { %v2753_v7 = vpop.permute.xlu1 %2752  ;;  %v2550_v2 = vmul.f32 0.35355338, %v2541_v1 }
 0xf9d   :  { %v2278_v30 = vmul.f32 1.442695, %v2276_v6 }
 0xf9f   :  { %4376 = vpow2.f32 %v2278_v30  ;;  %3038 = vrot.lane.b32.xlu1 %v2026_v0, %s4460_s19  ;;  %v5145_v0 = vld [vmem:[%s5318_s2] sm:$0xff] }
 0xfa0   :  { %v2749_v58 = vpop.permute.xlu1 %2748  ;;  %4378 = vpow2.f32 %v2280_v54  ;;  %v2552_v16 = vadd.f32 %v5145_v0, %v2550_v2 }
 0xfa1   :  { %4227 = vmatprep.mubr.msk.f32.mxu1 %vm509_vm7, %v2749_v58 }
 0xfa2   :  { %v2554_v8 = vsel %vm601_vm9, %v2552_v16, -inf }
 0xfa4   :  { %v2751_v9 = vpop.permute.xlu1 %2750 }
 0xfac   :  { %v4377_v31 = vpop.eup %4376 }
 0xfad   :  { %v2282_v12 = vsel %vm601_vm9, %v4377_v31, 0.0  ;;  %v4379_v22 = vpop.eup %4378 }
 0xfae   :  { %2283 = vadd.xlane.f32.xlu0 %v2282_v12  ;;  %v2285_v17 = vsel %vm605_vm8, %v4379_v22, 0.0 }
 0xfb2   :  { %2286 = vadd.xlane.f32.xlu0 %v2285_v17 }
 0xfc8   :  { %2754 = vrot.lane.b32.xlu0 %v5079_v61, %s4459_s18 }
 0xfe7   :  { %2555 = vmax.xlane.f32.xlu0 %v2554_v8 }
0x100b   :  { %v2559_v10 = vpop.xlane.xlu1 %2558 }
0x100c   :  { %v2561_v14 = vsub.f32 %v2553_v33, %v2559_v10 }
0x100e   :  { %v2564_v37 = vmul.f32 1.442695, %v2561_v14 }
0x100f   :  { %v2578_v63 = vpop.permute.xlu1 %2577 }
0x1010   :  { %4380 = vpow2.f32 %v2564_v37 }
0x1013   :  { %v3043_v40 = vpop.permute.xlu1 %3042 }
0x1017   :  { %v3041_v42 = vpop.permute.xlu1 %3040 }
0x101b   :  { %v3039_v14 = vpop.permute.xlu1 %3038 }
0x101d   :  { %v5149_v39 = vpop.eup %4380 }
0x101e   :  { %v2569_v61 = vsel %vm605_vm8, %v5149_v39, 0.0 }
0x101f   :  { %2570 = vadd.xlane.f32.xlu0 %v2569_v61 }
0x1037   :  { %v2284_v43 = vpop.xlane.xlu0 %2283 }
0x1038   :  { %4382 = vrcp.f32 %v2284_v43 }
0x103b   :  { %v2287_v45 = vpop.xlane.xlu0 %2286 }
0x103c   :  { %4384 = vrcp.f32 %v2287_v45 }
0x103f   :  { %v2755_v36 = vpop.permute.xlu0 %2754 }
0x1040   :  { %4223 = vmatprep.subr.msk.mxu1 %vm509_vm7, %v2755_v36 }
0x1041   :  { %4224 = vmatpush3.xpose.msk.msra.mxu1 %vm509_vm7, %v2755_v36 }
0x1042   :  { %4225 = vmatprep.subr.msk.mxu1 %vm509_vm7, %v2753_v7 }
0x1045   :  { %v4383_v47 = vpop.eup %4382  ;;  %4226 = vmatpush3.xpose.msk.msra.mxu1 %vm509_vm7, %v2753_v7 }
0x1046   :  { %4242 = vmatprep.subr.msk.mxu1 %vm509_vm7, %v3043_v40  ;;  %v2290_v41 = vmul.f32 %v4383_v47, %v4377_v31 }
0x1048   :  { %4196 = vmatprep.mubr.msk.f32.mxu0 %vm601_vm9, %v2290_v41  ;;  %4228 = vmatmul.mubr.msk.f32.vlgmr.msra.gmra.mxu1 %vm509_vm7, %v2751_v9 }
0x1049   :  { %v4385_v33 = vpop.eup %4384  ;;  %4243 = vmatpush3.xpose.msk.msra.mxu1 %vm509_vm7, %v3043_v40 }
0x104a   :  { %4244 = vmatprep.subr.msk.mxu1 %vm509_vm7, %v3041_v42  ;;  %v2291_v60 = vmul.f32 %v4385_v33, %v4379_v22 }
0x104c   :  { %4197 = vmatmul.mubr.msk.f32.vlgmr.msra.gmra.mxu0 %vm601_vm9, %v2291_v60 }
0x104d   :  { %4245 = vmatpush3.xpose.msk.msra.mxu1 %vm509_vm7, %v3041_v42  ;;  %4200 = vmatpush3.msra.mxu0 %v4755_v35 }
0x104e   :  { %4261 = vmatprep.subr.mxu1 %v4854_v49 }
0x1070   :  { %v2556_v62 = vpop.xlane.xlu0 %2555 }
0x1071   :  { %v2560_v5 = vsub.f32 %v2552_v16, %v2556_v62 }
0x1073   :  { %v2562_v6 = vmul.f32 1.442695, %v2560_v5 }
0x1075   :  { %4386 = vpow2.f32 %v2562_v6 }
0x1082   :  { %v4387_v7 = vpop.eup %4386 }
0x1083   :  { %v2566_v54 = vsel %vm601_vm9, %v4387_v7, 0.0 }
0x1084   :  { %2567 = vadd.xlane.f32.xlu0 %v2566_v54 }
0x109a   :  { %2579 = vrot.lane.b32.xlu0 %v5097_v11, %s4458_s11 }
0x109e   :  { %3036 = vrot.lane.b32.xlu0 %v5072_v57, %s4460_s19 }
0x10a8   :  { %v2571_v58 = vpop.xlane.xlu0 %2570 }
0x10a9   :  { %4388 = vrcp.f32 %v2571_v58 }
0x10b6   :  { %v4389_v37 = vpop.eup %4388 }
0x10b7   :  { %v2575_v45 = vmul.f32 %v4389_v37, %v5149_v39 }
0x1108   :  { %v4229_v30 = vpop.f32.mrf.mxu1 }
0x1109   :  { %v2840_v31 = vmul.f32 0.35355338, %v4229_v30 }
0x110a   :  { %v2830_v35 = vpop.f32.mrf.mxu1 }
0x110b   :  { %v2839_v12 = vmul.f32 0.35355338, %v2830_v35  ;;  %v2842_v22 = vadd.f32 %v5127_v28, %v2840_v31 }
0x110c   :  { %v4198_v17 = vpop.f32.mrf.mxu0 }
0x110d   :  { %v2568_v1 = vpop.xlane.xlu0 %2567  ;;  %v2846_v2 = vsel %vm605_vm8, %v2842_v22, -inf  ;;  %v2841_v16 = vadd.f32 %v5145_v0, %v2839_v12 }
0x110e   :  { %4390 = vrcp.f32 %v2568_v1  ;;  %v2367_v8 = vpop.f32.mrf.mxu0  ;;  %2847 = vmax.xlane.f32.xlu1 %v2846_v2 }
0x110f   :  { %4201 = vmatprep.mubr.msk.f32.mxu0 %vm509_vm7, %v2367_v8  ;;  %v2843_v57 = vsel %vm601_vm9, %v2841_v16, -inf }
0x1110   :  { %4202 = vmatmul.mubr.msk.f32.vlgmr.msra.gmra.mxu0 %vm509_vm7, %v4198_v17  ;;  %2844 = vmax.xlane.f32.xlu0 %v2843_v57 }
0x1111   :  { %v2580_v9 = vpop.permute.xlu0 %2579 }
0x1112   :  { %4211 = vmatprep.subr.msk.mxu0 %vm631_vm6, %v2580_v9 }
0x1113   :  { %4212 = vmatpush3.msk.msra.mxu0 %vm631_vm6, %v2580_v9 }
0x1114   :  { %4213 = vmatprep.subr.mxu0 %v2578_v63 }
0x1115   :  { %4214 = vmatpush3.msra.mxu0 %v2578_v63  ;;  %v3037_v10 = vpop.permute.xlu0 %3036 }
0x1116   :  { %4246 = vmatprep.mubr.msk.f32.mxu1 %vm509_vm7, %v3037_v10  ;;  %4218 = vmatprep.subr.mxu0 %v4781_v59 }
0x1117   :  { %4247 = vmatmul.mubr.msk.f32.vlgmr.msra.gmra.mxu1 %vm509_vm7, %v3039_v14 }
0x1118   :  { %4262 = vmatpush3.msra.mxu1 %v4854_v49 }
0x1119   :  { %4263 = vmatprep.subr.mxu1 %v4859_v15 }
0x111a   :  { %4264 = vmatpush3.msra.mxu1 %v4859_v15 }
0x111b   :  { %v4391_v61 = vpop.eup %4390  ;;  %4265 = vmatprep.subr.mxu1 %v4866_v51 }
0x111c   :  { %v2574_v43 = vmul.f32 %v4391_v61, %v4387_v7  ;;  %4266 = vmatpush3.msra.mxu1 %v4866_v51 }
0x111d   :  { %4267 = vmatprep.subr.mxu1 %v4873_v53 }
0x111e   :  { %4215 = vmatprep.mubr.msk.f32.mxu0 %vm601_vm9, %v2574_v43  ;;  %4268 = vmatpush3.msra.mxu1 %v4873_v53 }
0x111f   :  { %2865 = vrot.lane.b32.xlu1 %v5100_v4, %s4459_s18  ;;  %4216 = vmatmul.mubr.msk.f32.vlgmr.msra.gmra.mxu0 %vm601_vm9, %v2575_v45 }
0x1120   :  { %4219 = vmatpush3.msra.mxu0 %v4781_v59 }
0x1197   :  { %v2848_v49 = vpop.xlane.xlu1 %2847 }
0x1198   :  { %v2850_v15 = vsub.f32 %v2842_v22, %v2848_v49 }
0x1199   :  { %v2845_v63 = vpop.xlane.xlu0 %2844 }
0x119a   :  { %v2853_v36 = vmul.f32 1.442695, %v2850_v15  ;;  %v2849_v51 = vsub.f32 %v2841_v16, %v2845_v63 }
0x119b   :  { %v2866_v22 = vpop.permute.xlu1 %2865 }
0x119c   :  { %4392 = vpow2.f32 %v2853_v36  ;;  %v2851_v39 = vmul.f32 1.442695, %v2849_v51 }
0x119e   :  { %4394 = vpow2.f32 %v2851_v39 }
0x11a9   :  { %v4393_v40 = vpop.eup %4392 }
0x11aa   :  { %v2858_v47 = vsel %vm605_vm8, %v4393_v40, 0.0 }
0x11ab   :  { %v4395_v41 = vpop.eup %4394  ;;  %2859 = vadd.xlane.f32.xlu0 %v2858_v47 }
0x11ac   :  { %v2855_v53 = vsel %vm601_vm9, %v4395_v41, 0.0 }
0x11af   :  { %2856 = vadd.xlane.f32.xlu0 %v2855_v53 }
0x11c5   :  { %2867 = vrot.lane.b32.xlu0 %v5097_v11, %s4459_s18 }
0x11d0   :  { %v4203_v33 = vpop.f32.mrf.mxu0 }
0x11d2   :  { %v5200_v6 = vpop.f32.mrf.mxu0 }
0x11d7   :  { %v4248_v59 = vpop.f32.mrf.mxu1 }
0x11d8   :  { %v3128_v62 = vmul.f32 0.35355338, %v4248_v59  ;;  %v4433_v59 = vld [vmem:[%s5321_s5 + $0x7] ss:$0 sm:$0xff] }
0x11d9   :  { %v3118_v42 = vpop.f32.mrf.mxu1 }
0x11da   :  { %v3127_v60 = vmul.f32 0.35355338, %v3118_v42  ;;  %v3130_v30 = vadd.f32 %v5127_v28, %v3128_v62 }
0x11dc   :  { %v3129_v5 = vadd.f32 %v5145_v0, %v3127_v60  ;;  %v3134_v31 = vsel %vm605_vm8, %v3130_v30, -inf }
0x11de   :  { %v3131_v7 = vsel %vm601_vm9, %v3129_v5, -inf }
0x11df   :  { %v4217_v54 = vpop.f32.mrf.mxu0  ;;  %3132 = vmax.xlane.f32.xlu1 %v3131_v7 }
0x11e1   :  { %v2656_v58 = vpop.f32.mrf.mxu0 }
0x11e2   :  { %4220 = vmatprep.mubr.msk.f32.mxu0 %vm509_vm7, %v2656_v58 }
0x11e3   :  { %4221 = vmatmul.mubr.msk.f32.vlgmr.msra.gmra.mxu0 %vm509_vm7, %v4217_v54 }
0x11e4   :  { %3135 = vmax.xlane.f32.xlu0 %v3134_v31 }
0x1234   :  { %v2860_v35 = vpop.xlane.xlu0 %2859 }
0x1235   :  { %4396 = vrcp.f32 %v2860_v35 }
0x1238   :  { %v2857_v12 = vpop.xlane.xlu0 %2856 }
0x1239   :  { %4398 = vrcp.f32 %v2857_v12 }
0x123c   :  { %v2868_v0 = vpop.permute.xlu0 %2867 }
0x123d   :  { %4230 = vmatprep.subr.msk.mxu0 %vm631_vm6, %v2868_v0 }
0x123e   :  { %4231 = vmatpush3.msk.msra.mxu0 %vm631_vm6, %v2868_v0 }
0x123f   :  { %4232 = vmatprep.subr.mxu0 %v2866_v22 }
0x1240   :  { %4233 = vmatpush3.msra.mxu0 %v2866_v22 }
0x1241   :  { %4237 = vmatprep.subr.mxu0 %v4806_v55 }
0x1242   :  { %v4397_v28 = vpop.eup %4396 }
0x1243   :  { %v2864_v2 = vmul.f32 %v4397_v28, %v4393_v40 }
0x1246   :  { %v4399_v17 = vpop.eup %4398 }
0x1247   :  { %v2863_v1 = vmul.f32 %v4399_v17, %v4395_v41 }
0x1249   :  { %4234 = vmatprep.mubr.msk.f32.mxu0 %vm601_vm9, %v2863_v1  ;;  %v4434_v1 = vld [vmem:[%s5321_s5 + $0x8] ss:$0 sm:$0xff] }
0x124a   :  { %4235 = vmatmul.mubr.msk.f32.vlgmr.msra.gmra.mxu0 %vm601_vm9, %v2864_v2 }
0x124b   :  { %4238 = vmatpush3.msra.mxu0 %v4806_v55  ;;  %v2458_v55 = vadd.f32 %v4203_v33, %v4817_v56  ;;  %v2457_v33 = vadd.f32 %v4433_v59, %v5200_v6 }
0x1268   :  { %v3133_v16 = vpop.xlane.xlu1 %3132 }
0x1269   :  { %v3137_v8 = vsub.f32 %v3129_v5, %v3133_v16 }
0x126b   :  { %v3139_v57 = vmul.f32 1.442695, %v3137_v8  ;;  %v4435_v8 = vld [vmem:[%s5321_s5 + $0x9] ss:$0 sm:$0xff] }
0x126d   :  { %4400 = vpow2.f32 %v3139_v57  ;;  %v3136_v9 = vpop.xlane.xlu0 %3135 }
0x126e   :  { %v3138_v10 = vsub.f32 %v3130_v30, %v3136_v9 }
0x1270   :  { %v3141_v14 = vmul.f32 1.442695, %v3138_v10 }
0x1272   :  { %4402 = vpow2.f32 %v3141_v14  ;;  %v5327_v14 = vld [vmem:[#allocation5_spill] sm:$0xff] }
0x127a   :  { %v4401_v37 = vpop.eup %4400 }
0x127b   :  { %v3143_v61 = vsel %vm601_vm9, %v4401_v37, 0.0 }
0x127c   :  { %3144 = vadd.xlane.f32.xlu0 %v3143_v61 }
0x127f   :  { %v4403_v43 = vpop.eup %4402 }
0x1280   :  { %v3146_v45 = vsel %vm605_vm8, %v4403_v43, 0.0 }
0x1281   :  { %3147 = vadd.xlane.f32.xlu1 %v3146_v45 }
0x1292   :  { %3155 = vrot.lane.b32.xlu0 %v5097_v11, %s4460_s19  ;;  %3153 = vrot.lane.b32.xlu1 %v5100_v4, %s4460_s19 }
0x12a3   :  { %v4222_v49 = vpop.f32.mrf.mxu0 }
0x12a4   :  { %v2747_v15 = vadd.f32 %v4222_v49, %v2458_v55 }
0x12a5   :  { %v2737_v36 = vpop.f32.mrf.mxu0 }
0x12a6   :  { %v2746_v60 = vadd.f32 %v2737_v36, %v2457_v33 }
0x1305   :  { %v3145_v63 = vpop.xlane.xlu0 %3144 }
0x1306   :  { %4404 = vrcp.f32 %v3145_v63 }
0x1309   :  { %v3156_v51 = vpop.permute.xlu0 %3155 }
0x130a   :  { %v4236_v39 = vpop.f32.mrf.mxu0  ;;  %v3148_v40 = vpop.xlane.xlu1 %3147  ;;  %4249 = vmatprep.subr.msk.mxu0 %vm631_vm6, %v3156_v51 }
0x130b   :  { %4406 = vrcp.f32 %v3148_v40 }
0x130c   :  { %v2944_v47 = vpop.f32.mrf.mxu0 }
0x130d   :  { %4239 = vmatprep.mubr.msk.f32.mxu0 %vm509_vm7, %v2944_v47 }
0x130e   :  { %4240 = vmatmul.mubr.msk.f32.vlgmr.msra.gmra.mxu0 %vm509_vm7, %v4236_v39  ;;  %v3154_v11 = vpop.permute.xlu1 %3153 }
0x130f   :  { %4250 = vmatpush3.msk.msra.mxu0 %vm631_vm6, %v3156_v51 }
0x1310   :  { %4251 = vmatprep.subr.mxu0 %v3154_v11 }
0x1311   :  { %4252 = vmatpush3.msra.mxu0 %v3154_v11 }
0x1312   :  { %4256 = vmatprep.subr.mxu0 %v4829_v13 }
0x1313   :  { %v4405_v56 = vpop.eup %4404 }
0x1314   :  { %v3151_v4 = vmul.f32 %v4405_v56, %v4401_v37 }
0x1316   :  { %4253 = vmatprep.mubr.msk.f32.mxu0 %vm601_vm9, %v3151_v4 }
0x1318   :  { %v4407_v41 = vpop.eup %4406 }
0x1319   :  { %v3152_v53 = vmul.f32 %v4407_v41, %v4403_v43 }
0x131b   :  { %4254 = vmatmul.mubr.msk.f32.vlgmr.msra.gmra.mxu0 %vm601_vm9, %v3152_v53 }
0x131c   :  { %4257 = vmatpush3.msra.mxu0 %v4829_v13 }
0x131d   :  { %4272 = vmatprep.subr.mxu0 %v4899_v18 }
0x13ce   :  { %v4241_v42 = vpop.f32.mrf.mxu0 }
0x13cf   :  { %v3035_v62 = vadd.f32 %v4241_v42, %v2747_v15 }
0x13d0   :  { %v3025_v5 = vpop.f32.mrf.mxu0 }
0x13d1   :  { %v3034_v7 = vadd.f32 %v3025_v5, %v2746_v60 }
0x13db   :  { %v4255_v54 = vpop.f32.mrf.mxu0 }
0x13dd   :  { %v3232_v30 = vpop.f32.mrf.mxu0 }
0x13de   :  { %4258 = vmatprep.mubr.msk.f32.mxu0 %vm509_vm7, %v3232_v30 }
0x13df   :  { %4259 = vmatmul.mubr.msk.f32.vlgmr.msra.gmra.mxu0 %vm509_vm7, %v4255_v54 }
0x13e0   :  { %4273 = vmatpush3.msra.mxu0 %v4899_v18 }
0x13e1   :  { %4274 = vmatprep.subr.mxu0 %v4906_v44 }
0x13e2   :  { %4275 = vmatpush3.msra.mxu0 %v4906_v44 }
0x13e3   :  { %4276 = vmatprep.subr.mxu0 %v4913_v46 }
0x13e4   :  { %4277 = vmatpush3.msra.mxu0 %v4913_v46 }
0x13e5   :  { %4278 = vmatprep.subr.mxu0 %v4920_v48 }
0x13e6   :  { %4279 = vmatpush3.msra.mxu0 %v4920_v48 }
0x13e7   :  { %4280 = vmatprep.subr.mxu0 %v4927_v50 }
0x13e8   :  { %4281 = vmatpush3.msra.mxu0 %v4927_v50 }
0x13e9   :  { %4282 = vmatprep.subr.mxu0 %v4934_v52 }
0x13ea   :  { %4283 = vmatpush3.msra.mxu0 %v4934_v52 }
0x13eb   :  { %4284 = vmatprep.subr.mxu0 %v4941_v19 }
0x13ec   :  { %4285 = vmatpush3.msra.mxu0 %v4941_v19 }
0x13ed   :  { %4286 = vmatprep.subr.mxu0 %v4948_v20 }
0x13ee   :  { %4287 = vmatpush3.msra.mxu0 %v4948_v20 }
0x13ef   :  { %4288 = vmatprep.subr.mxu0 %v4955_v21 }
0x13f0   :  { %4289 = vmatpush3.msra.mxu0 %v4955_v21 }
0x13f1   :  { %4290 = vmatprep.subr.mxu0 %v4962_v23 }
0x13f2   :  { %4291 = vmatpush3.msra.mxu0 %v4962_v23 }
0x13f3   :  { %4292 = vmatprep.subr.mxu0 %v4969_v24 }
0x13f4   :  { %4293 = vmatpush3.msra.mxu0 %v4969_v24 }
0x13f5   :  { %4294 = vmatprep.subr.mxu0 %v4976_v25 }
0x13f6   :  { %4295 = vmatpush3.msra.mxu0 %v4976_v25 }
0x13f7   :  { %4296 = vmatprep.subr.mxu0 %v4983_v26 }
0x13f8   :  { %4297 = vmatpush3.msra.mxu0 %v4983_v26 }
0x13f9   :  { %4298 = vmatprep.subr.mxu0 %v4990_v27 }
0x13fa   :  { %4299 = vmatpush3.msra.mxu0 %v4990_v27 }
0x13fb   :  { %4300 = vmatprep.subr.mxu0 %v4996_v29 }
0x13fc   :  { %4301 = vmatpush3.msra.mxu0 %v4996_v29 }
0x13fd   :  { %4302 = vmatprep.subr.mxu0 %v5002_v34 }
0x13fe   :  { %4303 = vmatpush3.msra.mxu0 %v5002_v34 }
0x149f   :  { %v4260_v13 = vpop.f32.mrf.mxu0 }
0x14a0   :  { %v3323_v18 = vadd.f32 %v4260_v13, %v3035_v62 }
0x14a1   :  { %v3313_v44 = vpop.f32.mrf.mxu0 }
0x14a2   :  { %v3322_v46 = vadd.f32 %v3313_v44, %v3034_v7  ;;  %v3325_v48 = vadd.f32 %v3323_v18, %v5022_v32 }
0x14a4   :  { %v5268_v50 = vadd.f32 %v3322_v46, %v5026_v38  ;;  %v3329_v52 = vsel %vm224_vm5, %v3325_v48, 0.0 }
0x14a5   :  { %3330 = vadd.xlane.f32.xlu0 %v3329_v52 }
0x14a6   :  { %v3326_v19 = vsel %vm220_vm4, %v5268_v50, 0.0 }
0x14a7   :  { %3327 = vadd.xlane.f32.xlu1 %v3326_v19 }
0x152e   :  { %v3331_v20 = vpop.xlane.xlu0 %3330 }
0x152f   :  { %v3333_v21 = vmul.f32 0.03125, %v3331_v20 }
0x1530   :  { %v3328_v23 = vpop.xlane.xlu1 %3327 }
0x1531   :  { %v3335_v24 = vsub.f32 %v3325_v48, %v3333_v21  ;;  %v3332_v25 = vmul.f32 0.03125, %v3328_v23 }
0x1533   :  { %v3334_v26 = vsub.f32 %v5268_v50, %v3332_v25  ;;  %v3337_v27 = vmul.f32 %v3335_v24, %v3335_v24 }
0x1535   :  { %v3341_v29 = vsel %vm224_vm5, %v3337_v27, 0.0  ;;  %v3336_v34 = vmul.f32 %v3334_v26, %v3334_v26 }
0x1536   :  { %3342 = vadd.xlane.f32.xlu1 %v3341_v29 }
0x1537   :  { %v3338_v32 = vsel %vm220_vm4, %v3336_v34, 0.0 }
0x1538   :  { %3339 = vadd.xlane.f32.xlu0 %v3338_v32 }
0x15bf   :  { %v3343_v38 = vpop.xlane.xlu1 %3342 }
0x15c0   :  { %v3345_v6 = vmul.f32 0.03125, %v3343_v38 }
0x15c1   :  { %v3340_v58 = vpop.xlane.xlu0 %3339 }
0x15c2   :  { %v3347_v31 = vadd.f32 1e-05, %v3345_v6  ;;  %v3344_v35 = vmul.f32 0.03125, %v3340_v58 }
0x15c4   :  { %4408 = vrsqrt.f32 %v3347_v31  ;;  %v3346_v12 = vadd.f32 1e-05, %v3344_v35 }
0x15c6   :  { %4410 = vrsqrt.f32 %v3346_v12 }
0x15d1   :  { %v4409_v0 = vpop.eup %4408 }
0x15d2   :  { %v3351_v22 = vmul.f32 %v4409_v0, %v3335_v24 }
0x15d3   :  { %v4411_v28 = vpop.eup %4410 }
0x15d4   :  { %v3350_v17 = vmul.f32 %v4411_v28, %v3334_v26  ;;  %v3353_v2 = vmul.f32 %v4434_v1, %v3351_v22 }
0x15d6   :  { %v3352_v16 = vmul.f32 %v4434_v1, %v3350_v17  ;;  %v3355_v9 = vadd.f32 %v4435_v8, %v3353_v2 }
0x15d8   :  { %v3354_v57 = vadd.f32 %v4435_v8, %v3352_v16 }
0x15da   :  { %4269 = vmatprep.mubr.msk.f32.mxu1 %vm220_vm4, %v3354_v57 }
0x15db   :  { %4270 = vmatmul.mubr.msk.f32.vlgmr.msra.gmra.mxu1 %vm220_vm4, %v3355_v9 }
0x169b   :  { %v4271_v10 = vpop.f32.mrf.mxu1 }
0x169c   :  { %v3434_v37 = vadd.f32 %v4271_v10, %v5327_v14 }
0x169d   :  { %v3428_v61 = vpop.f32.mrf.mxu1 }
0x169e   :  { %v3440_v43 = vmul.f32 0.70710677, %v3434_v37  ;;  %v3429_v45 = vadd.f32 %v5327_v14, %v3428_v61  ;;  %v3438_v0 = vmul.f32 0.5, %v3434_v37 }
0x16a0   :  { %v3442_v55 = vand.u32 2147483647, %v3440_v43  ;;  %v3439_v49 = vmul.f32 0.70710677, %v3429_v45  ;;  %vm3482_vm12 = vcmp.ge.f32.partialorder %v3440_v43, 0.0  ;;  %v3437_v35 = vmul.f32 0.5, %v3429_v45 }
0x16a1   :  { %v4461_v45 = vmov 0.0  }
0x16a2   :  { %v3444_v15 = vmul.f32 0.3275911, %v3442_v55  ;;  %v3441_v63 = vand.u32 2147483647, %v3439_v49  ;;  %v3470_v40 = vsub.f32 0.0, %v3442_v55  ;;  %vm3481_vm13 = vcmp.ge.f32.partialorder %v3439_v49, 0.0  ;;  %4307 = vmatprep.subr.mxu1 %v4461_v45  ;;  %4315 = vmatprep.mubr.msk.f32.mxu1 %vm4462_vm14, %v4461_v45 }
0x16a3   :  { %v69_v49 = vld [vmem:[%s5320_s4 + $0x20] sm:$0xff] }
0x16a4   :  { %v3446_v36 = vadd.f32 1.0, %v3444_v15  ;;  %v3443_v51 = vmul.f32 0.3275911, %v3441_v63  ;;  %v3469_v47 = vsub.f32 0.0, %v3441_v63  ;;  %v3472_v11 = vmul.f32 %v3470_v40, %v3442_v55  ;;  %v70_v55 = vld [vmem:[%s5320_s4 + $0x28] sm:$0xff] }
0x16a6   :  { %4412 = vrcp.f32 %v3446_v36  ;;  %v3445_v39 = vadd.f32 1.0, %v3443_v51  ;;  %v3471_v4 = vmul.f32 %v3469_v47, %v3441_v63  ;;  %v3475_v53 = vmul.f32 1.442695, %v3472_v11  ;;  %v3789_v47 = vld [vmem:[%s5321_s5 + $0xc] ss:$0 sm:$0xff] }
0x16a8   :  { %4414 = vrcp.f32 %v3445_v39  ;;  %v3473_v42 = vmul.f32 1.442695, %v3471_v4  ;;  %v3788_v39 = vld [vmem:[%s5321_s5 + $0xb] ss:$0 sm:$0xff]  ;;  %v3790_v4 = vld [vmem:[%s5322_s6 + $0x1] ss:$0 sm:$0xff] }
0x16a9   :  { %4416 = vpow2.f32 %v3475_v53 }
0x16aa   :  { %4418 = vpow2.f32 %v3473_v42 }
0x16b3   :  { %v4413_v56 = vpop.eup %4412 }
0x16b4   :  { %v3452_v41 = vmul.f32 1.0614054, %v4413_v56 }
0x16b5   :  { %v4415_v59 = vpop.eup %4414 }
0x16b6   :  { %v3454_v33 = vadd.f32 -1.4531521, %v3452_v41  ;;  %v3451_v60 = vmul.f32 1.0614054, %v4415_v59  ;;  %v4417_v21 = vpop.eup %4416 }
0x16b7   :  { %v4419_v26 = vpop.eup %4418 }
0x16b8   :  { %v3456_v62 = vmul.f32 %v4413_v56, %v3454_v33  ;;  %v3453_v5 = vadd.f32 -1.4531521, %v3451_v60 }
0x16ba   :  { %v3458_v7 = vadd.f32 1.4214138, %v3456_v62  ;;  %v3455_v54 = vmul.f32 %v4415_v59, %v3453_v5 }
0x16bc   :  { %v3460_v30 = vmul.f32 %v4413_v56, %v3458_v7  ;;  %v3457_v13 = vadd.f32 1.4214138, %v3455_v54 }
0x16be   :  { %v3462_v18 = vadd.f32 -0.28449672, %v3460_v30  ;;  %v3459_v44 = vmul.f32 %v4415_v59, %v3457_v13 }
0x16c0   :  { %v3464_v46 = vmul.f32 %v4413_v56, %v3462_v18  ;;  %v3461_v48 = vadd.f32 -0.28449672, %v3459_v44 }
0x16c2   :  { %v3466_v52 = vadd.f32 0.2548296, %v3464_v46  ;;  %v3463_v19 = vmul.f32 %v4415_v59, %v3461_v48 }
0x16c4   :  { %v3468_v20 = vmul.f32 %v4413_v56, %v3466_v52  ;;  %v3465_v23 = vadd.f32 0.2548296, %v3463_v19 }
0x16c6   :  { %v3478_v24 = vmul.f32 %v4417_v21, %v3468_v20  ;;  %v3467_v25 = vmul.f32 %v4415_v59, %v3465_v23 }
0x16c8   :  { %v3480_v27 = vsub.f32 1.0, %v3478_v24  ;;  %v3477_v29 = vmul.f32 %v4419_v26, %v3467_v25 }
0x16ca   :  { %v3484_v34 = vsub.f32 0.0, %v3480_v27  ;;  %v3479_v32 = vsub.f32 1.0, %v3477_v29 }
0x16cc   :  { %v3486_v38 = vsel %vm3482_vm12, %v3480_v27, %v3484_v34  ;;  %v3483_v6 = vsub.f32 0.0, %v3479_v32 }
0x16cd   :  { %v3488_v58 = vadd.f32 1.0, %v3486_v38 }
0x16ce   :  { %v3485_v31 = vsel %vm3481_vm13, %v3479_v32, %v3483_v6 }
0x16cf   :  { %v3487_v12 = vadd.f32 1.0, %v3485_v31  ;;  %v3490_v28 = vmul.f32 %v3488_v58, %v3438_v0 }
0x16d1   :  { %v3489_v22 = vmul.f32 %v3487_v12, %v3437_v35 }
0x16d3   :  { %4304 = vmatprep.mubr.f32.mxu0 %v3489_v22 }
0x16d4   :  { %4305 = vmatmul.mubr.f32.vlgmr.msra.gmra.mxu0 %v3490_v28 }
0x1794   :  { %v4306_v17 = vpop.f32.mrf.mxu0 }
0x1796   :  { %v3557_v1 = vpop.f32.mrf.mxu0 }
0x1797   :  { %v3558_v2 = vadd.f32 %v5018_v3, %v3557_v1  ;;  %v72_v3 = vld [vmem:[%s5320_s4 + $0x38] sm:$0xff] }
0x1798   :  { %4308 = vmatpush3.msra.mxu1 %v72_v3 }
0x1799   :  { %v3565_v16 = vadd.f32 %v3558_v2, %v5268_v50  ;;  %4309 = vmatprep.subr.mxu1 %v4461_v45  ;;  %v71_v50 = vld [vmem:[%s5320_s4 + $0x30] sm:$0xff] }
0x179a   :  { %4310 = vmatpush3.msra.mxu1 %v71_v50 }
0x179b   :  { %v3567_v8 = vrot.slane %v3565_v16, 4  ;;  %4311 = vmatprep.subr.mxu1 %v4461_v45 }
0x179c   :  { %4312 = vmatpush3.msra.mxu1 %v70_v55 }
0x179d   :  { %v3569_v57 = vsel %vm206_vm1, %v3565_v16, %v3567_v8  ;;  %4313 = vmatprep.subr.mxu1 %v4461_v45 }
0x179e   :  { %v3570_v9 = vsel %vm224_vm5, %v3569_v57, 0.0  ;;  %4314 = vmatpush3.msra.mxu1 %v69_v49 }
0x179f   :  { %3571 = vadd.xlane.f32.xlu0 %v3570_v9 }
0x1828   :  { %v3572_v10 = vpop.xlane.xlu0 %3571 }
0x1829   :  { %v3573_v14 = vmul.f32 0.03125, %v3572_v10 }
0x182b   :  { %v3574_v61 = vsub.f32 %v3569_v57, %v3573_v14 }
0x182d   :  { %v3575_v37 = vmul.f32 %v3574_v61, %v3574_v61 }
0x182f   :  { %v3576_v43 = vsel %vm224_vm5, %v3575_v37, 0.0 }
0x1830   :  { %3577 = vadd.xlane.f32.xlu1 %v3576_v43 }
0x18b9   :  { %v3578_v15 = vpop.xlane.xlu1 %3577 }
0x18ba   :  { %v3579_v63 = vmul.f32 0.03125, %v3578_v15 }
0x18bc   :  { %v3580_v36 = vadd.f32 1e-05, %v3579_v63 }
0x18be   :  { %4420 = vrsqrt.f32 %v3580_v36 }
0x18cb   :  { %v4421_v51 = vpop.eup %4420 }
0x18cc   :  { %v3582_v40 = vmul.f32 %v4421_v51, %v3574_v61 }
0x18ce   :  { %v3587_v11 = vmul.f32 %v3788_v39, %v3582_v40 }
0x18d0   :  { %v3592_v56 = vadd.f32 %v3789_v47, %v3587_v11 }
0x18d2   :  { %4316 = vmatmul.mubr.msk.f32.vlgmr.msra.gmra.mxu1 %vm220_vm4, %v3592_v56 }
0x1992   :  { %v3666_v41 = vpop.f32.mrf.mxu1 }
0x1993   :  { %v3667_v53 = vadd.f32 %v3790_v4, %v3666_v41 }
0x1994   :  { %v4317_v59 = vpop.f32.mrf.mxu1 }
0x1995   :  { %3670 = vst [vmem:[#allocation2] sm:$0x3] %v3667_v53 }
0x1996   :  { %4447 = shalt.err (!%p4444_p4)
}
0x1997   :  { %3680 = dma.vmem_to_hbm [thread:$0]  %s3678_s25, 32, %s5323_s7, [#allocation3]  }
0x1998   :  { %4456 = dma.done.wait [#allocation3], 32  }
0x1999   :  { %4457 = vsyncadd [#allocation3], 4294967264 }
0x199a   :  { %3684 = vsyncpa [#allocation3], 1 }

</bundles_post_ra>
